<compile_context>
chip_gen: v7x
topology: tpu7x:2x2x1
jax: 0.10.0
libtpu: 0.0.40
codegen_flags: <defaults>
</compile_context>

<pallas_src>
import functools
import math

import jax
import jax.numpy as jnp
from jax import lax
from jax.experimental import pallas as pl
from jax.experimental.pallas import tpu as pltpu


# ----------------------------- in-kernel helpers ----------------------------

def _ln(x, g, b, eps):
    # LayerNorm over the last axis, all math in f32.
    mean = jnp.mean(x, axis=-1, keepdims=True)
    var = jnp.mean(jnp.square(x - mean), axis=-1, keepdims=True)
    return (x - mean) * lax.rsqrt(var + eps) * g + b


def _gelu(y):
    # TODO(synk): HF RoBERTa uses exact erf-GELU; tanh approximation used here.
    return 0.5 * y * (1.0 + jnp.tanh(0.7978845608028654 * (y + 0.044715 * y * y * y)))


# --------------------------- embedding LayerNorm ----------------------------

def _layer_norm_kernel(x_ref, g_ref, b_ref, o_ref, *, eps):
    o_ref[...] = _ln(x_ref[...], g_ref[...], b_ref[...], eps)


def layer_norm(x, gamma, beta, eps=1e-5, block_rows=512):
    """Row-tiled LayerNorm (no residual).  x: (M, H) f32."""
    M, H = x.shape
    tm = M if M <= block_rows else block_rows
    kern = functools.partial(_layer_norm_kernel, eps=eps)
    return pl.pallas_call(
        kern,
        out_shape=jax.ShapeDtypeStruct((M, H), jnp.float32),
        grid=(pl.cdiv(M, tm),),
        in_specs=[pl.BlockSpec((tm, H), lambda i: (i, 0)),
                  pl.BlockSpec((1, H), lambda i: (0, 0)),
                  pl.BlockSpec((1, H), lambda i: (0, 0))],
        out_specs=pl.BlockSpec((tm, H), lambda i: (i, 0)),
        compiler_params=pltpu.CompilerParams(dimension_semantics=("parallel",)),
    )(x, gamma.reshape(1, H), beta.reshape(1, H))


# -------------------- fused encoder stack (all layers, one call) ------------

def _encoder_stack_kernel(x_ref, m_ref,
                          wqkv_ref, bqkv_ref, wo_ref, bo_ref,
                          ln1_g_ref, ln1_b_ref,
                          w1_ref, b1_ref, w2_ref, b2_ref,
                          ln2_g_ref, ln2_b_ref,
                          cls_ref,
                          act_ref, qh_ref, kh_ref, vh_ref, ctxh_ref, ctxf_ref,
                          *, num_heads, head_dim, scale, eps):
    """Grid = (batch, layer).  Activation stays resident in act_ref across layers."""
    l = pl.program_id(1)
    S, H = act_ref.shape

    # Layer 0: load the LayerNormed embedding activation for this batch element.
    @pl.when(l == 0)
    def _():
        act_ref[...] = x_ref[...]

    x = act_ref[...]                                            # (S, H) f32
    mask_bc = jnp.broadcast_to(m_ref[...], (S, S))              # hoisted additive mask

    # ---- fused QKV projection: one MXU pass over x (bf16 in, f32 acc) ----
    qkv = jnp.dot(x.astype(jnp.bfloat16), wqkv_ref[...],
                  preferred_element_type=jnp.float32) + bqkv_ref[...]        # (S, 3H)

    # Single bf16 cast per Q/K/V slab; softmax scale folded into Q once.
    q_all = (qkv[:, :H] * scale).astype(jnp.bfloat16)
    k_all = qkv[:, H:2 * H].astype(jnp.bfloat16)
    v_all = qkv[:, 2 * H:].astype(jnp.bfloat16)

    # Split heads into (nH, S, Dh) scratch with static lane slices (cheap copies).
    for h in range(num_heads):
        lo = h * head_dim
        qh_ref[h] = q_all[:, lo:lo + head_dim]
        kh_ref[h] = k_all[:, lo:lo + head_dim]
        vh_ref[h] = v_all[:, lo:lo + head_dim]

    # Per-head attention in a fori_loop so per-head (S,S) buffers are reused.
    def head_body(h, carry):
        qh = qh_ref[h]                                          # (S, Dh) bf16
        kh = kh_ref[h]
        vh = vh_ref[h]
        s = lax.dot_general(qh, kh, (((1,), (1,)), ((), ())),
                            preferred_element_type=jnp.float32)              # (S, S)
        s = s + mask_bc
        s = s - jnp.max(s, axis=-1, keepdims=True)
        p = jnp.exp(s)
        p = p * pl.reciprocal(jnp.sum(p, axis=-1, keepdims=True), approx=True)
        ctxh_ref[h] = jnp.dot(p.astype(jnp.bfloat16), vh,
                              preferred_element_type=jnp.float32).astype(jnp.bfloat16)
        return carry

    _ = lax.fori_loop(0, num_heads, head_body, 0)

    # Merge heads (static lane slices) then ONE K=H output projection on the MXU.
    for h in range(num_heads):
        lo = h * head_dim
        ctxf_ref[:, lo:lo + head_dim] = ctxh_ref[h]

    attn_out = jnp.dot(ctxf_ref[...], wo_ref[...],
                       preferred_element_type=jnp.float32) + bo_ref[...]     # (S, H)
    x1 = _ln(x + attn_out, ln1_g_ref[...], ln1_b_ref[...], eps)

    # ---- feed-forward (GELU epilogue in f32, single bf16 cast before W2) ----
    hmid = jnp.dot(x1.astype(jnp.bfloat16), w1_ref[...],
                   preferred_element_type=jnp.float32) + b1_ref[...]         # (S, I)
    hmid = _gelu(hmid).astype(jnp.bfloat16)
    ffn_out = jnp.dot(hmid, w2_ref[...],
                      preferred_element_type=jnp.float32) + b2_ref[...]      # (S, H)

    y = _ln(x1 + ffn_out, ln2_g_ref[...], ln2_b_ref[...], eps)
    act_ref[...] = y

    # Only the CLS row ever leaves the kernel (pooler input); written on the last layer.
    @pl.when(l == pl.num_programs(1) - 1)
    def _():
        cls_ref[...] = y[0:1, :]


def encoder_stack(x, add_mask, stacked, *, num_heads, eps=1e-5):
    """x: (B, S, H) f32; add_mask: (B, 1, S) additive; returns CLS rows (B, H) f32."""
    B, S, H = x.shape
    L = stacked["wqkv"].shape[0]
    I = stacked["w1"].shape[2]
    Dh = H // num_heads
    kern = functools.partial(_encoder_stack_kernel, num_heads=num_heads,
                             head_dim=Dh, scale=1.0 / math.sqrt(Dh), eps=eps)

    def wspec(shape):
        # Layer-indexed weight/bias block: default double-buffering pipelines the
        # next layer's weight DMA while the current layer computes.
        return pl.BlockSpec((pl.Squeezed(),) + shape, lambda b, l: (l, 0, 0))

    cls = pl.pallas_call(
        kern,
        out_shape=jax.ShapeDtypeStruct((B, 1, H), jnp.float32),
        grid=(B, L),
        in_specs=[
            pl.BlockSpec((pl.Squeezed(), S, H), lambda b, l: (b, 0, 0)),   # x (layer-0 in)
            pl.BlockSpec((pl.Squeezed(), 1, S), lambda b, l: (b, 0, 0)),   # additive mask
            wspec((H, 3 * H)), wspec((1, 3 * H)),                          # Wqkv, bqkv
            wspec((H, H)), wspec((1, H)),                                  # Wo, bo
            wspec((1, H)), wspec((1, H)),                                  # attn LN g, b
            wspec((H, I)), wspec((1, I)),                                  # W1, b1
            wspec((I, H)), wspec((1, H)),                                  # W2, b2
            wspec((1, H)), wspec((1, H)),                                  # ffn LN g, b
        ],
        out_specs=pl.BlockSpec((pl.Squeezed(), 1, H), lambda b, l: (b, 0, 0)),
        scratch_shapes=[
            pltpu.VMEM((S, H), jnp.float32),                   # resident activation
            pltpu.VMEM((num_heads, S, Dh), jnp.bfloat16),      # Q heads
            pltpu.VMEM((num_heads, S, Dh), jnp.bfloat16),      # K heads
            pltpu.VMEM((num_heads, S, Dh), jnp.bfloat16),      # V heads
            pltpu.VMEM((num_heads, S, Dh), jnp.bfloat16),      # per-head context
            pltpu.VMEM((S, H), jnp.bfloat16),                  # merged context
        ],
        compiler_params=pltpu.CompilerParams(
            dimension_semantics=("parallel", "arbitrary"),
            vmem_limit_bytes=48 * 1024 * 1024),
    )(x, add_mask,
      stacked["wqkv"], stacked["bqkv"],
      stacked["wo"], stacked["bo"],
      stacked["ln1_g"], stacked["ln1_b"],
      stacked["w1"], stacked["b1"],
      stacked["w2"], stacked["b2"],
      stacked["ln2_g"], stacked["ln2_b"])
    return cls.reshape(B, H)


# ------------------------ pooler (CLS) + classifier --------------------------

def _pool_cls_kernel(x_ref, pw_ref, pb_ref, cw_ref, cb_ref, o_ref):
    # pooler: dense + tanh on the CLS token, then classifier (lane-padded output).
    pooled = jnp.tanh(jnp.dot(x_ref[...].astype(jnp.bfloat16), pw_ref[...],
                              preferred_element_type=jnp.float32) + pb_ref[...])
    # dropout(0.1) on pooled output: identity at inference
    o_ref[...] = jnp.dot(pooled.astype(jnp.bfloat16), cw_ref[...],
                         preferred_element_type=jnp.float32) + cb_ref[...]


def pool_classify(cls_tok, pool_w, pool_b, cls_w_pad, cls_b_pad):
    """cls_tok: (B, H) f32 -> (B, Cpad) logits (padded lanes; slice outside)."""
    B, H = cls_tok.shape
    Cp = cls_w_pad.shape[1]
    return pl.pallas_call(
        _pool_cls_kernel,
        out_shape=jax.ShapeDtypeStruct((B, Cp), jnp.float32),
        grid=(1,),
        in_specs=[pl.BlockSpec((B, H), lambda i: (0, 0)),
                  pl.BlockSpec((H, H), lambda i: (0, 0)),
                  pl.BlockSpec((1, H), lambda i: (0, 0)),
                  pl.BlockSpec((H, Cp), lambda i: (0, 0)),
                  pl.BlockSpec((1, Cp), lambda i: (0, 0))],
        out_specs=pl.BlockSpec((B, Cp), lambda i: (0, 0)),
    )(cls_tok, pool_w, pool_b.reshape(1, H), cls_w_pad, cls_b_pad.reshape(1, Cp))


# ------------------------------ Model (glue) --------------------------------

CFG = dict(vocab=100, max_pos=40, type_vocab=1, hidden=32, heads=4,
           layers=2, intermediate=64, num_classes=3, pad_token_id=1)


def init_params(key, cfg):
    H, I = cfg["hidden"], cfg["intermediate"]
    C, L = cfg["num_classes"], cfg["layers"]
    Cp = ((C + 127) // 128) * 128            # lane-dense classifier output
    pad = cfg["pad_token_id"]
    keys = iter(jax.random.split(key, 64))

    def w(shape, dtype=jnp.bfloat16):
        return (0.02 * jax.random.normal(next(keys), shape, dtype=jnp.float32)).astype(dtype)

    cls_w = w((H, C), jnp.float32)
    cls_w_pad = jnp.zeros((H, Cp), jnp.bfloat16).at[:, :C].set(cls_w.astype(jnp.bfloat16))

    # nn.Embedding(padding_idx=...) semantics at init: pad rows zeroed.
    word_emb = w((cfg["vocab"], H), jnp.float32).at[pad].set(0.0)
    pos_emb = w((cfg["max_pos"], H), jnp.float32).at[pad].set(0.0)

    params = dict(
        word_emb=word_emb,
        pos_emb=pos_emb,
        type_emb=w((cfg["type_vocab"], H), jnp.float32),
        emb_ln_g=jnp.ones((H,), jnp.float32), emb_ln_b=jnp.zeros((H,), jnp.float32),
        pool_w=w((H, H)), pool_b=jnp.zeros((H,), jnp.float32),
        cls_w_pad=cls_w_pad, cls_b_pad=jnp.zeros((Cp,), jnp.float32),
        # Per-layer weights stacked on a leading layer axis (layer grid axis in-kernel).
        stack=dict(
            wqkv=w((L, H, 3 * H)), bqkv=jnp.zeros((L, 1, 3 * H), jnp.float32),
            wo=w((L, H, H)), bo=jnp.zeros((L, 1, H), jnp.float32),
            ln1_g=jnp.ones((L, 1, H), jnp.float32), ln1_b=jnp.zeros((L, 1, H), jnp.float32),
            w1=w((L, H, I)), b1=jnp.zeros((L, 1, I), jnp.float32),
            w2=w((L, I, H)), b2=jnp.zeros((L, 1, H), jnp.float32),
            ln2_g=jnp.ones((L, 1, H), jnp.float32), ln2_b=jnp.zeros((L, 1, H), jnp.float32),
        ),
    )
    return params


def bert_classifier_forward(params, input_ids, attention_mask, cfg):
    B, S = input_ids.shape
    H, nH = cfg["hidden"], cfg["heads"]
    pad = cfg["pad_token_id"]

    # RoBERTa position ids: cumsum over non-pad tokens, offset by padding_idx.
    nonpad = (input_ids != pad).astype(jnp.int32)
    position_ids = jnp.cumsum(nonpad, axis=-1) * nonpad + pad
    # TODO(synk): HF errors when positions exceed max_position_embeddings; we clamp.
    position_ids = jnp.minimum(position_ids, cfg["max_pos"] - 1)
    token_type_ids = jnp.zeros_like(input_ids)

    # TODO(synk): embedding gather kept in plain JAX (jnp.take); no DMA-gather kernel.
    emb = (jnp.take(params["word_emb"], input_ids, axis=0)
           + jnp.take(params["pos_emb"], position_ids, axis=0)
           + jnp.take(params["type_emb"], token_type_ids, axis=0))           # (B, S, H)
    x = layer_norm(emb.reshape(B * S, H).astype(jnp.float32),
                   params["emb_ln_g"], params["emb_ln_b"]).reshape(B, S, H)
    # embedding dropout(0.1): identity at inference

    # additive attention mask per batch: (B, 1, S)
    add_mask = ((1.0 - attention_mask.astype(jnp.float32)) * -1e9).reshape(B, 1, S)

    # --- whole encoder: one pallas_call, grid=(batch, layer); returns CLS rows ---
    cls_tok = encoder_stack(x, add_mask, params["stack"], num_heads=nH)      # (B, H)

    # --- pooler (CLS dense + tanh) fused with classifier; dropout = identity ---
    logits_padded = pool_classify(cls_tok, params["pool_w"], params["pool_b"],
                                  params["cls_w_pad"], params["cls_b_pad"])
    return logits_padded[:, :cfg["num_classes"]]                             # (B, C)


if __name__ == "__main__":
    key = jax.random.PRNGKey(0)
    pkey, ikey = jax.random.split(key)

    B, S = 2, 8
    params = init_params(pkey, CFG)
    input_ids = jax.random.randint(ikey, (B, S), 0, CFG["vocab"], dtype=jnp.int32)
    attention_mask = jnp.ones((B, S), dtype=jnp.int32)

    fwd = jax.jit(functools.partial(bert_classifier_forward, cfg=CFG))
    logits = fwd(params, input_ids, attention_mask)
    logits = jax.block_until_ready(logits)
    assert logits.shape == (B, CFG["num_classes"])
    assert bool(jnp.all(jnp.isfinite(logits)))
    print("KERNEL_OK")
</pallas_src>

<mosaic_0001>
module attributes {stable_mosaic.version = 11 : i64} {
  func.func @_layer_norm_kernel(%arg0: i32, %arg1: memref<16x32xf32, #tpu.memory_space<vmem>>, %arg2: memref<1x32xf32, #tpu.memory_space<vmem>>, %arg3: memref<1x32xf32, #tpu.memory_space<vmem>>, %arg4: memref<16x32xf32, #tpu.memory_space<vmem>>) attributes {dimension_semantics = [#tpu.dimension_semantics<parallel>], iteration_bounds = array<i64: 1>, scalar_prefetch = 0 : i64, scratch_operands = 0 : i64, tpu.core_type = #tpu.core_type<tc>, window_params = [{transform_indices = @transform_0, window_bounds = array<i64: 16, 32>}, {pipeline_mode = #tpu.pipeline_mode<synchronous>, transform_indices = @transform_1, window_bounds = array<i64: 1, 32>}, {pipeline_mode = #tpu.pipeline_mode<synchronous>, transform_indices = @transform_2, window_bounds = array<i64: 1, 32>}, {transform_indices = @transform_3, window_bounds = array<i64: 16, 32>}]} {
    %c0 = arith.constant 0 : index
    %c0_0 = arith.constant 0 : index
    %0 = vector.load %arg1[%c0, %c0_0] : memref<16x32xf32, #tpu.memory_space<vmem>>, vector<16x32xf32>
    %c0_1 = arith.constant 0 : index
    %c0_2 = arith.constant 0 : index
    %1 = vector.load %arg2[%c0_1, %c0_2] : memref<1x32xf32, #tpu.memory_space<vmem>>, vector<1x32xf32>
    %c0_3 = arith.constant 0 : index
    %c0_4 = arith.constant 0 : index
    %2 = vector.load %arg3[%c0_3, %c0_4] : memref<1x32xf32, #tpu.memory_space<vmem>>, vector<1x32xf32>
    %cst = arith.constant dense<0.000000e+00> : vector<16xf32>
    %3 = vector.multi_reduction <add>, %0, %cst [1] : vector<16x32xf32> to vector<16xf32>
    %4 = vector.shape_cast %3 : vector<16xf32> to vector<16x1xf32>
    %cst_5 = arith.constant 3.200000e+01 : f32
    %5 = vector.broadcast %cst_5 : f32 to vector<16x1xf32>
    %6 = arith.divf %4, %5 : vector<16x1xf32>
    %7 = vector.broadcast %6 : vector<16x1xf32> to vector<16x32xf32>
    %8 = arith.subf %0, %7 : vector<16x32xf32>
    %9 = arith.mulf %8, %8 : vector<16x32xf32>
    %cst_6 = arith.constant dense<0.000000e+00> : vector<16xf32>
    %10 = vector.multi_reduction <add>, %9, %cst_6 [1] : vector<16x32xf32> to vector<16xf32>
    %11 = vector.shape_cast %10 : vector<16xf32> to vector<16x1xf32>
    %cst_7 = arith.constant 3.200000e+01 : f32
    %12 = vector.broadcast %cst_7 : f32 to vector<16x1xf32>
    %13 = arith.divf %11, %12 : vector<16x1xf32>
    %14 = vector.broadcast %6 : vector<16x1xf32> to vector<16x32xf32>
    %15 = arith.subf %0, %14 : vector<16x32xf32>
    %cst_8 = arith.constant 9.99999974E-6 : f32
    %16 = vector.broadcast %cst_8 : f32 to vector<16x1xf32>
    %17 = arith.addf %13, %16 : vector<16x1xf32>
    %18 = math.rsqrt %17 : vector<16x1xf32>
    %19 = vector.broadcast %18 : vector<16x1xf32> to vector<16x32xf32>
    %20 = arith.mulf %15, %19 : vector<16x32xf32>
    %21 = vector.broadcast %1 : vector<1x32xf32> to vector<16x32xf32>
    %22 = arith.mulf %20, %21 : vector<16x32xf32>
    %23 = vector.broadcast %2 : vector<1x32xf32> to vector<16x32xf32>
    %24 = arith.addf %22, %23 : vector<16x32xf32>
    %c0_9 = arith.constant 0 : index
    %c0_10 = arith.constant 0 : index
    %25 = vector.load %arg4[%c0_9, %c0_10] : memref<16x32xf32, #tpu.memory_space<vmem>>, vector<16x32xf32>
    tpu.vector_store %arg4[%c0_9, %c0_10], %24 {strides = array<i32>} : memref<16x32xf32, #tpu.memory_space<vmem>>, vector<16x32xf32>,
    return
  }
  func.func @transform_0(%arg0: i32) -> (i32, i32) {
    %c0_i32 = arith.constant 0 : i32
    %c0_i32_0 = arith.constant 0 : i32
    return %arg0, %c0_i32 : i32, i32
  }
  func.func @transform_1(%arg0: i32) -> (i32, i32) {
    %c0_i32 = arith.constant 0 : i32
    %c0_i32_0 = arith.constant 0 : i32
    %c0_i32_1 = arith.constant 0 : i32
    return %c0_i32, %c0_i32_0 : i32, i32
  }
  func.func @transform_2(%arg0: i32) -> (i32, i32) {
    %c0_i32 = arith.constant 0 : i32
    %c0_i32_0 = arith.constant 0 : i32
    %c0_i32_1 = arith.constant 0 : i32
    return %c0_i32, %c0_i32_0 : i32, i32
  }
  func.func @transform_3(%arg0: i32) -> (i32, i32) {
    %c0_i32 = arith.constant 0 : i32
    %c0_i32_0 = arith.constant 0 : i32
    return %arg0, %c0_i32 : i32, i32
  }
}

module attributes {stable_mosaic.version = 11 : i64} {
  func.func @_pool_cls_kernel(%arg0: i32, %arg1: memref<2x32xf32, #tpu.memory_space<vmem>>, %arg2: memref<32x32xbf16, #tpu.memory_space<vmem>>, %arg3: memref<1x32xf32, #tpu.memory_space<vmem>>, %arg4: memref<32x128xbf16, #tpu.memory_space<vmem>>, %arg5: memref<1x128xf32, #tpu.memory_space<vmem>>, %arg6: memref<2x128xf32, #tpu.memory_space<vmem>>) attributes {dimension_semantics = [#tpu.dimension_semantics<arbitrary>], iteration_bounds = array<i64: 1>, scalar_prefetch = 0 : i64, scratch_operands = 0 : i64, tpu.core_type = #tpu.core_type<tc>, window_params = [{pipeline_mode = #tpu.pipeline_mode<synchronous>, transform_indices = @transform_0, window_bounds = array<i64: 2, 32>}, {pipeline_mode = #tpu.pipeline_mode<synchronous>, transform_indices = @transform_1, window_bounds = array<i64: 32, 32>}, {pipeline_mode = #tpu.pipeline_mode<synchronous>, transform_indices = @transform_2, window_bounds = array<i64: 1, 32>}, {pipeline_mode = #tpu.pipeline_mode<synchronous>, transform_indices = @transform_3, window_bounds = array<i64: 32, 128>}, {pipeline_mode = #tpu.pipeline_mode<synchronous>, transform_indices = @transform_4, window_bounds = array<i64: 1, 128>}, {pipeline_mode = #tpu.pipeline_mode<synchronous>, transform_indices = @transform_5, window_bounds = array<i64: 2, 128>}]} {
    %c0 = arith.constant 0 : index
    %c0_0 = arith.constant 0 : index
    %0 = vector.load %arg1[%c0, %c0_0] : memref<2x32xf32, #tpu.memory_space<vmem>>, vector<2x32xf32>
    %1 = arith.truncf %0 : vector<2x32xf32> to vector<2x32xbf16>
    %c0_1 = arith.constant 0 : index
    %c0_2 = arith.constant 0 : index
    %2 = vector.load %arg2[%c0_1, %c0_2] : memref<32x32xbf16, #tpu.memory_space<vmem>>, vector<32x32xbf16>
    %cst = arith.constant dense<0.000000e+00> : vector<2x32xf32>
    %3 = tpu.matmul %1, %2, %cst {dimension_numbers = #tpu.dot_dimension_numbers<[1], [0], [0], [1], [0, 0, 1, 1], [], []>} : vector<2x32xbf16>, vector<32x32xbf16>, vector<2x32xf32> -> vector<2x32xf32>
    %c0_3 = arith.constant 0 : index
    %c0_4 = arith.constant 0 : index
    %4 = vector.load %arg3[%c0_3, %c0_4] : memref<1x32xf32, #tpu.memory_space<vmem>>, vector<1x32xf32>
    %5 = vector.broadcast %4 : vector<1x32xf32> to vector<2x32xf32>
    %6 = arith.addf %3, %5 : vector<2x32xf32>
    %7 = math.tanh %6 : vector<2x32xf32>
    %8 = arith.truncf %7 : vector<2x32xf32> to vector<2x32xbf16>
    %c0_5 = arith.constant 0 : index
    %c0_6 = arith.constant 0 : index
    %9 = vector.load %arg4[%c0_5, %c0_6] : memref<32x128xbf16, #tpu.memory_space<vmem>>, vector<32x128xbf16>
    %cst_7 = arith.constant dense<0.000000e+00> : vector<2x128xf32>
    %10 = tpu.matmul %8, %9, %cst_7 {dimension_numbers = #tpu.dot_dimension_numbers<[1], [0], [0], [1], [0, 0, 1, 1], [], []>} : vector<2x32xbf16>, vector<32x128xbf16>, vector<2x128xf32> -> vector<2x128xf32>
    %c0_8 = arith.constant 0 : index
    %c0_9 = arith.constant 0 : index
    %11 = vector.load %arg5[%c0_8, %c0_9] : memref<1x128xf32, #tpu.memory_space<vmem>>, vector<1x128xf32>
    %12 = vector.broadcast %11 : vector<1x128xf32> to vector<2x128xf32>
    %13 = arith.addf %10, %12 : vector<2x128xf32>
    %c0_10 = arith.constant 0 : index
    %c0_11 = arith.constant 0 : index
    %14 = vector.load %arg6[%c0_10, %c0_11] : memref<2x128xf32, #tpu.memory_space<vmem>>, vector<2x128xf32>
    tpu.vector_store %arg6[%c0_10, %c0_11], %13 {strides = array<i32>} : memref<2x128xf32, #tpu.memory_space<vmem>>, vector<2x128xf32>,
    return
  }
  func.func @transform_0(%arg0: i32) -> (i32, i32) {
    %c0_i32 = arith.constant 0 : i32
    %c0_i32_0 = arith.constant 0 : i32
    %c0_i32_1 = arith.constant 0 : i32
    return %c0_i32, %c0_i32_0 : i32, i32
  }
  func.func @transform_1(%arg0: i32) -> (i32, i32) {
    %c0_i32 = arith.constant 0 : i32
    %c0_i32_0 = arith.constant 0 : i32
    %c0_i32_1 = arith.constant 0 : i32
    return %c0_i32, %c0_i32_0 : i32, i32
  }
  func.func @transform_2(%arg0: i32) -> (i32, i32) {
    %c0_i32 = arith.constant 0 : i32
    %c0_i32_0 = arith.constant 0 : i32
    %c0_i32_1 = arith.constant 0 : i32
    return %c0_i32, %c0_i32_0 : i32, i32
  }
  func.func @transform_3(%arg0: i32) -> (i32, i32) {
    %c0_i32 = arith.constant 0 : i32
    %c0_i32_0 = arith.constant 0 : i32
    %c0_i32_1 = arith.constant 0 : i32
    return %c0_i32, %c0_i32_0 : i32, i32
  }
  func.func @transform_4(%arg0: i32) -> (i32, i32) {
    %c0_i32 = arith.constant 0 : i32
    %c0_i32_0 = arith.constant 0 : i32
    %c0_i32_1 = arith.constant 0 : i32
    return %c0_i32, %c0_i32_0 : i32, i32
  }
  func.func @transform_5(%arg0: i32) -> (i32, i32) {
    %c0_i32 = arith.constant 0 : i32
    %c0_i32_0 = arith.constant 0 : i32
    %c0_i32_1 = arith.constant 0 : i32
    return %c0_i32, %c0_i32_0 : i32, i32
  }
}

module attributes {stable_mosaic.version = 11 : i64} {
  func.func @_encoder_stack_kernel(%arg0: i32, %arg1: i32, %arg2: memref<1x8x32xf32, #tpu.memory_space<vmem>>, %arg3: memref<1x1x8xf32, #tpu.memory_space<vmem>>, %arg4: memref<1x32x96xbf16, #tpu.memory_space<vmem>>, %arg5: memref<1x1x96xf32, #tpu.memory_space<vmem>>, %arg6: memref<1x32x32xbf16, #tpu.memory_space<vmem>>, %arg7: memref<1x1x32xf32, #tpu.memory_space<vmem>>, %arg8: memref<1x1x32xf32, #tpu.memory_space<vmem>>, %arg9: memref<1x1x32xf32, #tpu.memory_space<vmem>>, %arg10: memref<1x32x64xbf16, #tpu.memory_space<vmem>>, %arg11: memref<1x1x64xf32, #tpu.memory_space<vmem>>, %arg12: memref<1x64x32xbf16, #tpu.memory_space<vmem>>, %arg13: memref<1x1x32xf32, #tpu.memory_space<vmem>>, %arg14: memref<1x1x32xf32, #tpu.memory_space<vmem>>, %arg15: memref<1x1x32xf32, #tpu.memory_space<vmem>>, %arg16: memref<1x1x32xf32, #tpu.memory_space<vmem>>, %arg17: memref<8x32xf32, #tpu.memory_space<vmem>>, %arg18: memref<4x8x8xbf16, #tpu.memory_space<vmem>>, %arg19: memref<4x8x8xbf16, #tpu.memory_space<vmem>>, %arg20: memref<4x8x8xbf16, #tpu.memory_space<vmem>>, %arg21: memref<4x8x8xbf16, #tpu.memory_space<vmem>>, %arg22: memref<8x32xbf16, #tpu.memory_space<vmem>>) attributes {dimension_semantics = [#tpu.dimension_semantics<parallel>, #tpu.dimension_semantics<arbitrary>], iteration_bounds = array<i64: 2, 2>, scalar_prefetch = 0 : i64, scratch_operands = 6 : i64, tpu.core_type = #tpu.core_type<tc>, window_params = [{transform_indices = @transform_0, window_bounds = array<i64: 1, 8, 32>}, {transform_indices = @transform_1, window_bounds = array<i64: 1, 1, 8>}, {transform_indices = @transform_2, window_bounds = array<i64: 1, 32, 96>}, {transform_indices = @transform_3, window_bounds = array<i64: 1, 1, 96>}, {transform_indices = @transform_4, window_bounds = array<i64: 1, 32, 32>}, {transform_indices = @transform_5, window_bounds = array<i64: 1, 1, 32>}, {transform_indices = @transform_6, window_bounds = array<i64: 1, 1, 32>}, {transform_indices = @transform_7, window_bounds = array<i64: 1, 1, 32>}, {transform_indices = @transform_8, window_bounds = array<i64: 1, 32, 64>}, {transform_indices = @transform_9, window_bounds = array<i64: 1, 1, 64>}, {transform_indices = @transform_10, window_bounds = array<i64: 1, 64, 32>}, {transform_indices = @transform_11, window_bounds = array<i64: 1, 1, 32>}, {transform_indices = @transform_12, window_bounds = array<i64: 1, 1, 32>}, {transform_indices = @transform_13, window_bounds = array<i64: 1, 1, 32>}, {transform_indices = @transform_14, window_bounds = array<i64: 1, 1, 32>}]} {
    %c0_i32 = arith.constant 0 : i32
    %0 = arith.cmpi eq, %arg1, %c0_i32 : i32
    %1 = arith.extui %0 : i1 to i32
    %c0_i32_0 = arith.constant 0 : i32
    %2 = arith.cmpi ne, %1, %c0_i32_0 : i32
    scf.if %2 {
      %c0_117 = arith.constant 0 : index
      %c0_118 = arith.constant 0 : index
      %c0_119 = arith.constant 0 : index
      %180 = vector.load %arg2[%c0_117, %c0_118, %c0_119] : memref<1x8x32xf32, #tpu.memory_space<vmem>>, vector<1x8x32xf32>
      %181 = vector.shape_cast %180 : vector<1x8x32xf32> to vector<8x32xf32>
      %c0_120 = arith.constant 0 : index
      %c0_121 = arith.constant 0 : index
      %182 = vector.load %arg17[%c0_120, %c0_121] : memref<8x32xf32, #tpu.memory_space<vmem>>, vector<8x32xf32>
      tpu.vector_store %arg17[%c0_120, %c0_121], %181 {strides = array<i32>} : memref<8x32xf32, #tpu.memory_space<vmem>>, vector<8x32xf32>,
    } else {
    }
    %c0 = arith.constant 0 : index
    %c0_1 = arith.constant 0 : index
    %3 = vector.load %arg17[%c0, %c0_1] : memref<8x32xf32, #tpu.memory_space<vmem>>, vector<8x32xf32>
    %c0_2 = arith.constant 0 : index
    %c0_3 = arith.constant 0 : index
    %c0_4 = arith.constant 0 : index
    %4 = vector.load %arg3[%c0_2, %c0_3, %c0_4] : memref<1x1x8xf32, #tpu.memory_space<vmem>>, vector<1x1x8xf32>
    %5 = vector.shape_cast %4 : vector<1x1x8xf32> to vector<1x8xf32>
    %6 = vector.shape_cast %5 : vector<1x8xf32> to vector<1x8xf32>
    %7 = vector.broadcast %6 : vector<1x8xf32> to vector<8x8xf32>
    %8 = arith.truncf %3 : vector<8x32xf32> to vector<8x32xbf16>
    %c0_5 = arith.constant 0 : index
    %c0_6 = arith.constant 0 : index
    %c0_7 = arith.constant 0 : index
    %9 = vector.load %arg4[%c0_5, %c0_6, %c0_7] : memref<1x32x96xbf16, #tpu.memory_space<vmem>>, vector<1x32x96xbf16>
    %10 = vector.shape_cast %9 : vector<1x32x96xbf16> to vector<32x96xbf16>
    %cst = arith.constant dense<0.000000e+00> : vector<8x96xf32>
    %11 = tpu.matmul %8, %10, %cst {dimension_numbers = #tpu.dot_dimension_numbers<[1], [0], [0], [1], [0, 0, 1, 1], [], []>} : vector<8x32xbf16>, vector<32x96xbf16>, vector<8x96xf32> -> vector<8x96xf32>
    %c0_8 = arith.constant 0 : index
    %c0_9 = arith.constant 0 : index
    %c0_10 = arith.constant 0 : index
    %12 = vector.load %arg5[%c0_8, %c0_9, %c0_10] : memref<1x1x96xf32, #tpu.memory_space<vmem>>, vector<1x1x96xf32>
    %13 = vector.shape_cast %12 : vector<1x1x96xf32> to vector<1x96xf32>
    %14 = vector.broadcast %13 : vector<1x96xf32> to vector<8x96xf32>
    %15 = arith.addf %11, %14 : vector<8x96xf32>
    %16 = vector.extract_strided_slice %15 {offsets = [0, 0], sizes = [8, 32], strides = [1, 1]} : vector<8x96xf32> to vector<8x32xf32>
    %cst_11 = arith.constant 0.353553385 : f32
    %17 = vector.broadcast %cst_11 : f32 to vector<8x32xf32>
    %18 = arith.mulf %16, %17 : vector<8x32xf32>
    %19 = arith.truncf %18 : vector<8x32xf32> to vector<8x32xbf16>
    %20 = vector.extract_strided_slice %15 {offsets = [0, 32], sizes = [8, 32], strides = [1, 1]} : vector<8x96xf32> to vector<8x32xf32>
    %21 = arith.truncf %20 : vector<8x32xf32> to vector<8x32xbf16>
    %22 = vector.extract_strided_slice %15 {offsets = [0, 64], sizes = [8, 32], strides = [1, 1]} : vector<8x96xf32> to vector<8x32xf32>
    %23 = arith.truncf %22 : vector<8x32xf32> to vector<8x32xbf16>
    %24 = vector.extract_strided_slice %19 {offsets = [0, 0], sizes = [8, 8], strides = [1, 1]} : vector<8x32xbf16> to vector<8x8xbf16>
    %c0_12 = arith.constant 0 : index
    %c0_13 = arith.constant 0 : index
    %c0_14 = arith.constant 0 : index
    %25 = vector.load %arg18[%c0_12, %c0_13, %c0_14] : memref<4x8x8xbf16, #tpu.memory_space<vmem>>, vector<1x8x8xbf16>
    %26 = vector.shape_cast %25 : vector<1x8x8xbf16> to vector<8x8xbf16>
    %27 = vector.shape_cast %24 : vector<8x8xbf16> to vector<1x8x8xbf16>
    tpu.vector_store %arg18[%c0_12, %c0_13, %c0_14], %27 {strides = array<i32>} : memref<4x8x8xbf16, #tpu.memory_space<vmem>>, vector<1x8x8xbf16>,
    %28 = vector.extract_strided_slice %21 {offsets = [0, 0], sizes = [8, 8], strides = [1, 1]} : vector<8x32xbf16> to vector<8x8xbf16>
    %c0_15 = arith.constant 0 : index
    %c0_16 = arith.constant 0 : index
    %c0_17 = arith.constant 0 : index
    %29 = vector.load %arg19[%c0_15, %c0_16, %c0_17] : memref<4x8x8xbf16, #tpu.memory_space<vmem>>, vector<1x8x8xbf16>
    %30 = vector.shape_cast %29 : vector<1x8x8xbf16> to vector<8x8xbf16>
    %31 = vector.shape_cast %28 : vector<8x8xbf16> to vector<1x8x8xbf16>
    tpu.vector_store %arg19[%c0_15, %c0_16, %c0_17], %31 {strides = array<i32>} : memref<4x8x8xbf16, #tpu.memory_space<vmem>>, vector<1x8x8xbf16>,
    %32 = vector.extract_strided_slice %23 {offsets = [0, 0], sizes = [8, 8], strides = [1, 1]} : vector<8x32xbf16> to vector<8x8xbf16>
    %c0_18 = arith.constant 0 : index
    %c0_19 = arith.constant 0 : index
    %c0_20 = arith.constant 0 : index
    %33 = vector.load %arg20[%c0_18, %c0_19, %c0_20] : memref<4x8x8xbf16, #tpu.memory_space<vmem>>, vector<1x8x8xbf16>
    %34 = vector.shape_cast %33 : vector<1x8x8xbf16> to vector<8x8xbf16>
    %35 = vector.shape_cast %32 : vector<8x8xbf16> to vector<1x8x8xbf16>
    tpu.vector_store %arg20[%c0_18, %c0_19, %c0_20], %35 {strides = array<i32>} : memref<4x8x8xbf16, #tpu.memory_space<vmem>>, vector<1x8x8xbf16>,
    %36 = vector.extract_strided_slice %19 {offsets = [0, 8], sizes = [8, 8], strides = [1, 1]} : vector<8x32xbf16> to vector<8x8xbf16>
    %c1 = arith.constant 1 : index
    %c0_21 = arith.constant 0 : index
    %c0_22 = arith.constant 0 : index
    %37 = vector.load %arg18[%c1, %c0_21, %c0_22] : memref<4x8x8xbf16, #tpu.memory_space<vmem>>, vector<1x8x8xbf16>
    %38 = vector.shape_cast %37 : vector<1x8x8xbf16> to vector<8x8xbf16>
    %39 = vector.shape_cast %36 : vector<8x8xbf16> to vector<1x8x8xbf16>
    tpu.vector_store %arg18[%c1, %c0_21, %c0_22], %39 {strides = array<i32>} : memref<4x8x8xbf16, #tpu.memory_space<vmem>>, vector<1x8x8xbf16>,
    %40 = vector.extract_strided_slice %21 {offsets = [0, 8], sizes = [8, 8], strides = [1, 1]} : vector<8x32xbf16> to vector<8x8xbf16>
    %c1_23 = arith.constant 1 : index
    %c0_24 = arith.constant 0 : index
    %c0_25 = arith.constant 0 : index
    %41 = vector.load %arg19[%c1_23, %c0_24, %c0_25] : memref<4x8x8xbf16, #tpu.memory_space<vmem>>, vector<1x8x8xbf16>
    %42 = vector.shape_cast %41 : vector<1x8x8xbf16> to vector<8x8xbf16>
    %43 = vector.shape_cast %40 : vector<8x8xbf16> to vector<1x8x8xbf16>
    tpu.vector_store %arg19[%c1_23, %c0_24, %c0_25], %43 {strides = array<i32>} : memref<4x8x8xbf16, #tpu.memory_space<vmem>>, vector<1x8x8xbf16>,
    %44 = vector.extract_strided_slice %23 {offsets = [0, 8], sizes = [8, 8], strides = [1, 1]} : vector<8x32xbf16> to vector<8x8xbf16>
    %c1_26 = arith.constant 1 : index
    %c0_27 = arith.constant 0 : index
    %c0_28 = arith.constant 0 : index
    %45 = vector.load %arg20[%c1_26, %c0_27, %c0_28] : memref<4x8x8xbf16, #tpu.memory_space<vmem>>, vector<1x8x8xbf16>
    %46 = vector.shape_cast %45 : vector<1x8x8xbf16> to vector<8x8xbf16>
    %47 = vector.shape_cast %44 : vector<8x8xbf16> to vector<1x8x8xbf16>
    tpu.vector_store %arg20[%c1_26, %c0_27, %c0_28], %47 {strides = array<i32>} : memref<4x8x8xbf16, #tpu.memory_space<vmem>>, vector<1x8x8xbf16>,
    %48 = vector.extract_strided_slice %19 {offsets = [0, 16], sizes = [8, 8], strides = [1, 1]} : vector<8x32xbf16> to vector<8x8xbf16>
    %c2 = arith.constant 2 : index
    %c0_29 = arith.constant 0 : index
    %c0_30 = arith.constant 0 : index
    %49 = vector.load %arg18[%c2, %c0_29, %c0_30] : memref<4x8x8xbf16, #tpu.memory_space<vmem>>, vector<1x8x8xbf16>
    %50 = vector.shape_cast %49 : vector<1x8x8xbf16> to vector<8x8xbf16>
    %51 = vector.shape_cast %48 : vector<8x8xbf16> to vector<1x8x8xbf16>
    tpu.vector_store %arg18[%c2, %c0_29, %c0_30], %51 {strides = array<i32>} : memref<4x8x8xbf16, #tpu.memory_space<vmem>>, vector<1x8x8xbf16>,
    %52 = vector.extract_strided_slice %21 {offsets = [0, 16], sizes = [8, 8], strides = [1, 1]} : vector<8x32xbf16> to vector<8x8xbf16>
    %c2_31 = arith.constant 2 : index
    %c0_32 = arith.constant 0 : index
    %c0_33 = arith.constant 0 : index
    %53 = vector.load %arg19[%c2_31, %c0_32, %c0_33] : memref<4x8x8xbf16, #tpu.memory_space<vmem>>, vector<1x8x8xbf16>
    %54 = vector.shape_cast %53 : vector<1x8x8xbf16> to vector<8x8xbf16>
    %55 = vector.shape_cast %52 : vector<8x8xbf16> to vector<1x8x8xbf16>
    tpu.vector_store %arg19[%c2_31, %c0_32, %c0_33], %55 {strides = array<i32>} : memref<4x8x8xbf16, #tpu.memory_space<vmem>>, vector<1x8x8xbf16>,
    %56 = vector.extract_strided_slice %23 {offsets = [0, 16], sizes = [8, 8], strides = [1, 1]} : vector<8x32xbf16> to vector<8x8xbf16>
    %c2_34 = arith.constant 2 : index
    %c0_35 = arith.constant 0 : index
    %c0_36 = arith.constant 0 : index
    %57 = vector.load %arg20[%c2_34, %c0_35, %c0_36] : memref<4x8x8xbf16, #tpu.memory_space<vmem>>, vector<1x8x8xbf16>
    %58 = vector.shape_cast %57 : vector<1x8x8xbf16> to vector<8x8xbf16>
    %59 = vector.shape_cast %56 : vector<8x8xbf16> to vector<1x8x8xbf16>
    tpu.vector_store %arg20[%c2_34, %c0_35, %c0_36], %59 {strides = array<i32>} : memref<4x8x8xbf16, #tpu.memory_space<vmem>>, vector<1x8x8xbf16>,
    %60 = vector.extract_strided_slice %19 {offsets = [0, 24], sizes = [8, 8], strides = [1, 1]} : vector<8x32xbf16> to vector<8x8xbf16>
    %c3 = arith.constant 3 : index
    %c0_37 = arith.constant 0 : index
    %c0_38 = arith.constant 0 : index
    %61 = vector.load %arg18[%c3, %c0_37, %c0_38] : memref<4x8x8xbf16, #tpu.memory_space<vmem>>, vector<1x8x8xbf16>
    %62 = vector.shape_cast %61 : vector<1x8x8xbf16> to vector<8x8xbf16>
    %63 = vector.shape_cast %60 : vector<8x8xbf16> to vector<1x8x8xbf16>
    tpu.vector_store %arg18[%c3, %c0_37, %c0_38], %63 {strides = array<i32>} : memref<4x8x8xbf16, #tpu.memory_space<vmem>>, vector<1x8x8xbf16>,
    %64 = vector.extract_strided_slice %21 {offsets = [0, 24], sizes = [8, 8], strides = [1, 1]} : vector<8x32xbf16> to vector<8x8xbf16>
    %c3_39 = arith.constant 3 : index
    %c0_40 = arith.constant 0 : index
    %c0_41 = arith.constant 0 : index
    %65 = vector.load %arg19[%c3_39, %c0_40, %c0_41] : memref<4x8x8xbf16, #tpu.memory_space<vmem>>, vector<1x8x8xbf16>
    %66 = vector.shape_cast %65 : vector<1x8x8xbf16> to vector<8x8xbf16>
    %67 = vector.shape_cast %64 : vector<8x8xbf16> to vector<1x8x8xbf16>
    tpu.vector_store %arg19[%c3_39, %c0_40, %c0_41], %67 {strides = array<i32>} : memref<4x8x8xbf16, #tpu.memory_space<vmem>>, vector<1x8x8xbf16>,
    %68 = vector.extract_strided_slice %23 {offsets = [0, 24], sizes = [8, 8], strides = [1, 1]} : vector<8x32xbf16> to vector<8x8xbf16>
    %c3_42 = arith.constant 3 : index
    %c0_43 = arith.constant 0 : index
    %c0_44 = arith.constant 0 : index
    %69 = vector.load %arg20[%c3_42, %c0_43, %c0_44] : memref<4x8x8xbf16, #tpu.memory_space<vmem>>, vector<1x8x8xbf16>
    %70 = vector.shape_cast %69 : vector<1x8x8xbf16> to vector<8x8xbf16>
    %71 = vector.shape_cast %68 : vector<8x8xbf16> to vector<1x8x8xbf16>
    tpu.vector_store %arg20[%c3_42, %c0_43, %c0_44], %71 {strides = array<i32>} : memref<4x8x8xbf16, #tpu.memory_space<vmem>>, vector<1x8x8xbf16>,
    %c0_i32_45 = arith.constant 0 : i32
    %c4_i32 = arith.constant 4 : i32
    %72 = arith.addi %c0_i32_45, %c4_i32 : i32
    %c1_i32 = arith.constant 1 : i32
    scf.for %arg23 = %c0_i32_45 to %72 step %c1_i32  : i32 {
      %180 = arith.index_cast %arg23 : i32 to index
      %c0_117 = arith.constant 0 : index
      %c0_118 = arith.constant 0 : index
      %181 = vector.load %arg18[%180, %c0_117, %c0_118] : memref<4x8x8xbf16, #tpu.memory_space<vmem>>, vector<1x8x8xbf16>
      %182 = vector.shape_cast %181 : vector<1x8x8xbf16> to vector<8x8xbf16>
      %183 = arith.index_cast %arg23 : i32 to index
      %c0_119 = arith.constant 0 : index
      %c0_120 = arith.constant 0 : index
      %184 = vector.load %arg19[%183, %c0_119, %c0_120] : memref<4x8x8xbf16, #tpu.memory_space<vmem>>, vector<1x8x8xbf16>
      %185 = vector.shape_cast %184 : vector<1x8x8xbf16> to vector<8x8xbf16>
      %186 = arith.index_cast %arg23 : i32 to index
      %c0_121 = arith.constant 0 : index
      %c0_122 = arith.constant 0 : index
      %187 = vector.load %arg20[%186, %c0_121, %c0_122] : memref<4x8x8xbf16, #tpu.memory_space<vmem>>, vector<1x8x8xbf16>
      %188 = vector.shape_cast %187 : vector<1x8x8xbf16> to vector<8x8xbf16>
      %cst_123 = arith.constant dense<0.000000e+00> : vector<8x8xf32>
      %189 = tpu.matmul %182, %185, %cst_123 {dimension_numbers = #tpu.dot_dimension_numbers<[1], [1], [0], [0], [0, 0, 1, 0], [], []>} : vector<8x8xbf16>, vector<8x8xbf16>, vector<8x8xf32> -> vector<8x8xf32>
      %190 = arith.addf %189, %7 : vector<8x8xf32>
      %cst_124 = arith.constant dense<0xFF800000> : vector<8xf32>
      %191 = vector.multi_reduction <maximumf>, %190, %cst_124 [1] : vector<8x8xf32> to vector<8xf32>
      %192 = vector.shape_cast %191 : vector<8xf32> to vector<8x1xf32>
      %193 = vector.broadcast %192 : vector<8x1xf32> to vector<8x8xf32>
      %194 = arith.subf %190, %193 : vector<8x8xf32>
      %195 = math.exp %194 : vector<8x8xf32>
      %cst_125 = arith.constant dense<0.000000e+00> : vector<8xf32>
      %196 = vector.multi_reduction <add>, %195, %cst_125 [1] : vector<8x8xf32> to vector<8xf32>
      %197 = vector.shape_cast %196 : vector<8xf32> to vector<8x1xf32>
      %198 = tpu.reciprocal %197 {approx = true} : vector<8x1xf32> -> vector<8x1xf32>
      %199 = vector.broadcast %198 : vector<8x1xf32> to vector<8x8xf32>
      %200 = arith.mulf %195, %199 : vector<8x8xf32>
      %201 = arith.truncf %200 : vector<8x8xf32> to vector<8x8xbf16>
      %cst_126 = arith.constant dense<0.000000e+00> : vector<8x8xf32>
      %202 = tpu.matmul %201, %188, %cst_126 {dimension_numbers = #tpu.dot_dimension_numbers<[1], [0], [0], [1], [0, 0, 1, 1], [], []>} : vector<8x8xbf16>, vector<8x8xbf16>, vector<8x8xf32> -> vector<8x8xf32>
      %203 = arith.truncf %202 : vector<8x8xf32> to vector<8x8xbf16>
      %204 = arith.index_cast %arg23 : i32 to index
      %c0_127 = arith.constant 0 : index
      %c0_128 = arith.constant 0 : index
      %205 = vector.load %arg21[%204, %c0_127, %c0_128] : memref<4x8x8xbf16, #tpu.memory_space<vmem>>, vector<1x8x8xbf16>
      %206 = vector.shape_cast %205 : vector<1x8x8xbf16> to vector<8x8xbf16>
      %207 = vector.shape_cast %203 : vector<8x8xbf16> to vector<1x8x8xbf16>
      tpu.vector_store %arg21[%204, %c0_127, %c0_128], %207 {strides = array<i32>} : memref<4x8x8xbf16, #tpu.memory_space<vmem>>, vector<1x8x8xbf16>,
    }
    %c4_i32_46 = arith.constant 4 : i32
    %c0_47 = arith.constant 0 : index
    %c0_48 = arith.constant 0 : index
    %c0_49 = arith.constant 0 : index
    %73 = vector.load %arg21[%c0_47, %c0_48, %c0_49] : memref<4x8x8xbf16, #tpu.memory_space<vmem>>, vector<1x8x8xbf16>
    %74 = vector.shape_cast %73 : vector<1x8x8xbf16> to vector<8x8xbf16>
    %c0_50 = arith.constant 0 : index
    %c0_51 = arith.constant 0 : index
    %75 = vector.load %arg22[%c0_50, %c0_51] : memref<8x32xbf16, #tpu.memory_space<vmem>>, vector<8x8xbf16>
    tpu.vector_store %arg22[%c0_50, %c0_51], %74 {strides = array<i32>} : memref<8x32xbf16, #tpu.memory_space<vmem>>, vector<8x8xbf16>,
    %c1_52 = arith.constant 1 : index
    %c0_53 = arith.constant 0 : index
    %c0_54 = arith.constant 0 : index
    %76 = vector.load %arg21[%c1_52, %c0_53, %c0_54] : memref<4x8x8xbf16, #tpu.memory_space<vmem>>, vector<1x8x8xbf16>
    %77 = vector.shape_cast %76 : vector<1x8x8xbf16> to vector<8x8xbf16>
    %c0_55 = arith.constant 0 : index
    %c8 = arith.constant 8 : index
    %78 = vector.load %arg22[%c0_55, %c8] : memref<8x32xbf16, #tpu.memory_space<vmem>>, vector<8x8xbf16>
    tpu.vector_store %arg22[%c0_55, %c8], %77 {strides = array<i32>} : memref<8x32xbf16, #tpu.memory_space<vmem>>, vector<8x8xbf16>,
    %c2_56 = arith.constant 2 : index
    %c0_57 = arith.constant 0 : index
    %c0_58 = arith.constant 0 : index
    %79 = vector.load %arg21[%c2_56, %c0_57, %c0_58] : memref<4x8x8xbf16, #tpu.memory_space<vmem>>, vector<1x8x8xbf16>
    %80 = vector.shape_cast %79 : vector<1x8x8xbf16> to vector<8x8xbf16>
    %c0_59 = arith.constant 0 : index
    %c16 = arith.constant 16 : index
    %81 = vector.load %arg22[%c0_59, %c16] : memref<8x32xbf16, #tpu.memory_space<vmem>>, vector<8x8xbf16>
    tpu.vector_store %arg22[%c0_59, %c16], %80 {strides = array<i32>} : memref<8x32xbf16, #tpu.memory_space<vmem>>, vector<8x8xbf16>,
    %c3_60 = arith.constant 3 : index
    %c0_61 = arith.constant 0 : index
    %c0_62 = arith.constant 0 : index
    %82 = vector.load %arg21[%c3_60, %c0_61, %c0_62] : memref<4x8x8xbf16, #tpu.memory_space<vmem>>, vector<1x8x8xbf16>
    %83 = vector.shape_cast %82 : vector<1x8x8xbf16> to vector<8x8xbf16>
    %c0_63 = arith.constant 0 : index
    %c24 = arith.constant 24 : index
    %84 = vector.load %arg22[%c0_63, %c24] : memref<8x32xbf16, #tpu.memory_space<vmem>>, vector<8x8xbf16>
    tpu.vector_store %arg22[%c0_63, %c24], %83 {strides = array<i32>} : memref<8x32xbf16, #tpu.memory_space<vmem>>, vector<8x8xbf16>,
    %c0_64 = arith.constant 0 : index
    %c0_65 = arith.constant 0 : index
    %85 = vector.load %arg22[%c0_64, %c0_65] : memref<8x32xbf16, #tpu.memory_space<vmem>>, vector<8x32xbf16>
    %c0_66 = arith.constant 0 : index
    %c0_67 = arith.constant 0 : index
    %c0_68 = arith.constant 0 : index
    %86 = vector.load %arg6[%c0_66, %c0_67, %c0_68] : memref<1x32x32xbf16, #tpu.memory_space<vmem>>, vector<1x32x32xbf16>
    %87 = vector.shape_cast %86 : vector<1x32x32xbf16> to vector<32x32xbf16>
    %cst_69 = arith.constant dense<0.000000e+00> : vector<8x32xf32>
    %88 = tpu.matmul %85, %87, %cst_69 {dimension_numbers = #tpu.dot_dimension_numbers<[1], [0], [0], [1], [0, 0, 1, 1], [], []>} : vector<8x32xbf16>, vector<32x32xbf16>, vector<8x32xf32> -> vector<8x32xf32>
    %c0_70 = arith.constant 0 : index
    %c0_71 = arith.constant 0 : index
    %c0_72 = arith.constant 0 : index
    %89 = vector.load %arg7[%c0_70, %c0_71, %c0_72] : memref<1x1x32xf32, #tpu.memory_space<vmem>>, vector<1x1x32xf32>
    %90 = vector.shape_cast %89 : vector<1x1x32xf32> to vector<1x32xf32>
    %91 = vector.broadcast %90 : vector<1x32xf32> to vector<8x32xf32>
    %92 = arith.addf %88, %91 : vector<8x32xf32>
    %93 = arith.addf %3, %92 : vector<8x32xf32>
    %c0_73 = arith.constant 0 : index
    %c0_74 = arith.constant 0 : index
    %c0_75 = arith.constant 0 : index
    %94 = vector.load %arg8[%c0_73, %c0_74, %c0_75] : memref<1x1x32xf32, #tpu.memory_space<vmem>>, vector<1x1x32xf32>
    %95 = vector.shape_cast %94 : vector<1x1x32xf32> to vector<1x32xf32>
    %c0_76 = arith.constant 0 : index
    %c0_77 = arith.constant 0 : index
    %c0_78 = arith.constant 0 : index
    %96 = vector.load %arg9[%c0_76, %c0_77, %c0_78] : memref<1x1x32xf32, #tpu.memory_space<vmem>>, vector<1x1x32xf32>
    %97 = vector.shape_cast %96 : vector<1x1x32xf32> to vector<1x32xf32>
    %cst_79 = arith.constant dense<0.000000e+00> : vector<8xf32>
    %98 = vector.multi_reduction <add>, %93, %cst_79 [1] : vector<8x32xf32> to vector<8xf32>
    %99 = vector.shape_cast %98 : vector<8xf32> to vector<8x1xf32>
    %cst_80 = arith.constant 3.200000e+01 : f32
    %100 = vector.broadcast %cst_80 : f32 to vector<8x1xf32>
    %101 = arith.divf %99, %100 : vector<8x1xf32>
    %102 = vector.broadcast %101 : vector<8x1xf32> to vector<8x32xf32>
    %103 = arith.subf %93, %102 : vector<8x32xf32>
    %104 = arith.mulf %103, %103 : vector<8x32xf32>
    %cst_81 = arith.constant dense<0.000000e+00> : vector<8xf32>
    %105 = vector.multi_reduction <add>, %104, %cst_81 [1] : vector<8x32xf32> to vector<8xf32>
    %106 = vector.shape_cast %105 : vector<8xf32> to vector<8x1xf32>
    %cst_82 = arith.constant 3.200000e+01 : f32
    %107 = vector.broadcast %cst_82 : f32 to vector<8x1xf32>
    %108 = arith.divf %106, %107 : vector<8x1xf32>
    %109 = vector.broadcast %101 : vector<8x1xf32> to vector<8x32xf32>
    %110 = arith.subf %93, %109 : vector<8x32xf32>
    %cst_83 = arith.constant 9.99999974E-6 : f32
    %111 = vector.broadcast %cst_83 : f32 to vector<8x1xf32>
    %112 = arith.addf %108, %111 : vector<8x1xf32>
    %113 = math.rsqrt %112 : vector<8x1xf32>
    %114 = vector.broadcast %113 : vector<8x1xf32> to vector<8x32xf32>
    %115 = arith.mulf %110, %114 : vector<8x32xf32>
    %116 = vector.broadcast %95 : vector<1x32xf32> to vector<8x32xf32>
    %117 = arith.mulf %115, %116 : vector<8x32xf32>
    %118 = vector.broadcast %97 : vector<1x32xf32> to vector<8x32xf32>
    %119 = arith.addf %117, %118 : vector<8x32xf32>
    %120 = arith.truncf %119 : vector<8x32xf32> to vector<8x32xbf16>
    %c0_84 = arith.constant 0 : index
    %c0_85 = arith.constant 0 : index
    %c0_86 = arith.constant 0 : index
    %121 = vector.load %arg10[%c0_84, %c0_85, %c0_86] : memref<1x32x64xbf16, #tpu.memory_space<vmem>>, vector<1x32x64xbf16>
    %122 = vector.shape_cast %121 : vector<1x32x64xbf16> to vector<32x64xbf16>
    %cst_87 = arith.constant dense<0.000000e+00> : vector<8x64xf32>
    %123 = tpu.matmul %120, %122, %cst_87 {dimension_numbers = #tpu.dot_dimension_numbers<[1], [0], [0], [1], [0, 0, 1, 1], [], []>} : vector<8x32xbf16>, vector<32x64xbf16>, vector<8x64xf32> -> vector<8x64xf32>
    %c0_88 = arith.constant 0 : index
    %c0_89 = arith.constant 0 : index
    %c0_90 = arith.constant 0 : index
    %124 = vector.load %arg11[%c0_88, %c0_89, %c0_90] : memref<1x1x64xf32, #tpu.memory_space<vmem>>, vector<1x1x64xf32>
    %125 = vector.shape_cast %124 : vector<1x1x64xf32> to vector<1x64xf32>
    %126 = vector.broadcast %125 : vector<1x64xf32> to vector<8x64xf32>
    %127 = arith.addf %123, %126 : vector<8x64xf32>
    %cst_91 = arith.constant 5.000000e-01 : f32
    %128 = vector.broadcast %cst_91 : f32 to vector<8x64xf32>
    %129 = arith.mulf %128, %127 : vector<8x64xf32>
    %cst_92 = arith.constant 4.471500e-02 : f32
    %130 = vector.broadcast %cst_92 : f32 to vector<8x64xf32>
    %131 = arith.mulf %130, %127 : vector<8x64xf32>
    %132 = arith.mulf %131, %127 : vector<8x64xf32>
    %133 = arith.mulf %132, %127 : vector<8x64xf32>
    %134 = arith.addf %127, %133 : vector<8x64xf32>
    %cst_93 = arith.constant 0.797884583 : f32
    %135 = vector.broadcast %cst_93 : f32 to vector<8x64xf32>
    %136 = arith.mulf %135, %134 : vector<8x64xf32>
    %137 = math.tanh %136 : vector<8x64xf32>
    %cst_94 = arith.constant 1.000000e+00 : f32
    %138 = vector.broadcast %cst_94 : f32 to vector<8x64xf32>
    %139 = arith.addf %138, %137 : vector<8x64xf32>
    %140 = arith.mulf %129, %139 : vector<8x64xf32>
    %141 = arith.truncf %140 : vector<8x64xf32> to vector<8x64xbf16>
    %c0_95 = arith.constant 0 : index
    %c0_96 = arith.constant 0 : index
    %c0_97 = arith.constant 0 : index
    %142 = vector.load %arg12[%c0_95, %c0_96, %c0_97] : memref<1x64x32xbf16, #tpu.memory_space<vmem>>, vector<1x64x32xbf16>
    %143 = vector.shape_cast %142 : vector<1x64x32xbf16> to vector<64x32xbf16>
    %cst_98 = arith.constant dense<0.000000e+00> : vector<8x32xf32>
    %144 = tpu.matmul %141, %143, %cst_98 {dimension_numbers = #tpu.dot_dimension_numbers<[1], [0], [0], [1], [0, 0, 1, 1], [], []>} : vector<8x64xbf16>, vector<64x32xbf16>, vector<8x32xf32> -> vector<8x32xf32>
    %c0_99 = arith.constant 0 : index
    %c0_100 = arith.constant 0 : index
    %c0_101 = arith.constant 0 : index
    %145 = vector.load %arg13[%c0_99, %c0_100, %c0_101] : memref<1x1x32xf32, #tpu.memory_space<vmem>>, vector<1x1x32xf32>
    %146 = vector.shape_cast %145 : vector<1x1x32xf32> to vector<1x32xf32>
    %147 = vector.broadcast %146 : vector<1x32xf32> to vector<8x32xf32>
    %148 = arith.addf %144, %147 : vector<8x32xf32>
    %149 = arith.addf %119, %148 : vector<8x32xf32>
    %c0_102 = arith.constant 0 : index
    %c0_103 = arith.constant 0 : index
    %c0_104 = arith.constant 0 : index
    %150 = vector.load %arg14[%c0_102, %c0_103, %c0_104] : memref<1x1x32xf32, #tpu.memory_space<vmem>>, vector<1x1x32xf32>
    %151 = vector.shape_cast %150 : vector<1x1x32xf32> to vector<1x32xf32>
    %c0_105 = arith.constant 0 : index
    %c0_106 = arith.constant 0 : index
    %c0_107 = arith.constant 0 : index
    %152 = vector.load %arg15[%c0_105, %c0_106, %c0_107] : memref<1x1x32xf32, #tpu.memory_space<vmem>>, vector<1x1x32xf32>
    %153 = vector.shape_cast %152 : vector<1x1x32xf32> to vector<1x32xf32>
    %cst_108 = arith.constant dense<0.000000e+00> : vector<8xf32>
    %154 = vector.multi_reduction <add>, %149, %cst_108 [1] : vector<8x32xf32> to vector<8xf32>
    %155 = vector.shape_cast %154 : vector<8xf32> to vector<8x1xf32>
    %cst_109 = arith.constant 3.200000e+01 : f32
    %156 = vector.broadcast %cst_109 : f32 to vector<8x1xf32>
    %157 = arith.divf %155, %156 : vector<8x1xf32>
    %158 = vector.broadcast %157 : vector<8x1xf32> to vector<8x32xf32>
    %159 = arith.subf %149, %158 : vector<8x32xf32>
    %160 = arith.mulf %159, %159 : vector<8x32xf32>
    %cst_110 = arith.constant dense<0.000000e+00> : vector<8xf32>
    %161 = vector.multi_reduction <add>, %160, %cst_110 [1] : vector<8x32xf32> to vector<8xf32>
    %162 = vector.shape_cast %161 : vector<8xf32> to vector<8x1xf32>
    %cst_111 = arith.constant 3.200000e+01 : f32
    %163 = vector.broadcast %cst_111 : f32 to vector<8x1xf32>
    %164 = arith.divf %162, %163 : vector<8x1xf32>
    %165 = vector.broadcast %157 : vector<8x1xf32> to vector<8x32xf32>
    %166 = arith.subf %149, %165 : vector<8x32xf32>
    %cst_112 = arith.constant 9.99999974E-6 : f32
    %167 = vector.broadcast %cst_112 : f32 to vector<8x1xf32>
    %168 = arith.addf %164, %167 : vector<8x1xf32>
    %169 = math.rsqrt %168 : vector<8x1xf32>
    %170 = vector.broadcast %169 : vector<8x1xf32> to vector<8x32xf32>
    %171 = arith.mulf %166, %170 : vector<8x32xf32>
    %172 = vector.broadcast %151 : vector<1x32xf32> to vector<8x32xf32>
    %173 = arith.mulf %171, %172 : vector<8x32xf32>
    %174 = vector.broadcast %153 : vector<1x32xf32> to vector<8x32xf32>
    %175 = arith.addf %173, %174 : vector<8x32xf32>
    %c0_113 = arith.constant 0 : index
    %c0_114 = arith.constant 0 : index
    %176 = vector.load %arg17[%c0_113, %c0_114] : memref<8x32xf32, #tpu.memory_space<vmem>>, vector<8x32xf32>
    tpu.vector_store %arg17[%c0_113, %c0_114], %175 {strides = array<i32>} : memref<8x32xf32, #tpu.memory_space<vmem>>, vector<8x32xf32>,
    %c1_i32_115 = arith.constant 1 : i32
    %177 = arith.cmpi eq, %arg1, %c1_i32_115 : i32
    %178 = arith.extui %177 : i1 to i32
    %c0_i32_116 = arith.constant 0 : i32
    %179 = arith.cmpi ne, %178, %c0_i32_116 : i32
    scf.if %179 {
      %180 = vector.extract_strided_slice %175 {offsets = [0, 0], sizes = [1, 32], strides = [1, 1]} : vector<8x32xf32> to vector<1x32xf32>
      %c0_117 = arith.constant 0 : index
      %c0_118 = arith.constant 0 : index
      %c0_119 = arith.constant 0 : index
      %181 = vector.load %arg16[%c0_117, %c0_118, %c0_119] : memref<1x1x32xf32, #tpu.memory_space<vmem>>, vector<1x1x32xf32>
      %182 = vector.shape_cast %181 : vector<1x1x32xf32> to vector<1x32xf32>
      %183 = vector.shape_cast %180 : vector<1x32xf32> to vector<1x1x32xf32>
      tpu.vector_store %arg16[%c0_117, %c0_118, %c0_119], %183 {strides = array<i32>} : memref<1x1x32xf32, #tpu.memory_space<vmem>>, vector<1x1x32xf32>,
    } else {
    }
    return
  }
  func.func @transform_0(%arg0: i32, %arg1: i32) -> (i32, i32, i32) {
    %c0_i32 = arith.constant 0 : i32
    %c0_i32_0 = arith.constant 0 : i32
    %c0_i32_1 = arith.constant 0 : i32
    return %arg0, %c0_i32, %c0_i32_0 : i32, i32, i32
  }
  func.func @transform_1(%arg0: i32, %arg1: i32) -> (i32, i32, i32) {
    %c0_i32 = arith.constant 0 : i32
    %c0_i32_0 = arith.constant 0 : i32
    %c0_i32_1 = arith.constant 0 : i32
    return %arg0, %c0_i32, %c0_i32_0 : i32, i32, i32
  }
  func.func @transform_2(%arg0: i32, %arg1: i32) -> (i32, i32, i32) {
    %c0_i32 = arith.constant 0 : i32
    %c0_i32_0 = arith.constant 0 : i32
    %c0_i32_1 = arith.constant 0 : i32
    return %arg1, %c0_i32, %c0_i32_0 : i32, i32, i32
  }
  func.func @transform_3(%arg0: i32, %arg1: i32) -> (i32, i32, i32) {
    %c0_i32 = arith.constant 0 : i32
    %c0_i32_0 = arith.constant 0 : i32
    %c0_i32_1 = arith.constant 0 : i32
    return %arg1, %c0_i32, %c0_i32_0 : i32, i32, i32
  }
  func.func @transform_4(%arg0: i32, %arg1: i32) -> (i32, i32, i32) {
    %c0_i32 = arith.constant 0 : i32
    %c0_i32_0 = arith.constant 0 : i32
    %c0_i32_1 = arith.constant 0 : i32
    return %arg1, %c0_i32, %c0_i32_0 : i32, i32, i32
  }
  func.func @transform_5(%arg0: i32, %arg1: i32) -> (i32, i32, i32) {
    %c0_i32 = arith.constant 0 : i32
    %c0_i32_0 = arith.constant 0 : i32
    %c0_i32_1 = arith.constant 0 : i32
    return %arg1, %c0_i32, %c0_i32_0 : i32, i32, i32
  }
  func.func @transform_6(%arg0: i32, %arg1: i32) -> (i32, i32, i32) {
    %c0_i32 = arith.constant 0 : i32
    %c0_i32_0 = arith.constant 0 : i32
    %c0_i32_1 = arith.constant 0 : i32
    return %arg1, %c0_i32, %c0_i32_0 : i32, i32, i32
  }
  func.func @transform_7(%arg0: i32, %arg1: i32) -> (i32, i32, i32) {
    %c0_i32 = arith.constant 0 : i32
    %c0_i32_0 = arith.constant 0 : i32
    %c0_i32_1 = arith.constant 0 : i32
    return %arg1, %c0_i32, %c0_i32_0 : i32, i32, i32
  }
  func.func @transform_8(%arg0: i32, %arg1: i32) -> (i32, i32, i32) {
    %c0_i32 = arith.constant 0 : i32
    %c0_i32_0 = arith.constant 0 : i32
    %c0_i32_1 = arith.constant 0 : i32
    return %arg1, %c0_i32, %c0_i32_0 : i32, i32, i32
  }
  func.func @transform_9(%arg0: i32, %arg1: i32) -> (i32, i32, i32) {
    %c0_i32 = arith.constant 0 : i32
    %c0_i32_0 = arith.constant 0 : i32
    %c0_i32_1 = arith.constant 0 : i32
    return %arg1, %c0_i32, %c0_i32_0 : i32, i32, i32
  }
  func.func @transform_10(%arg0: i32, %arg1: i32) -> (i32, i32, i32) {
    %c0_i32 = arith.constant 0 : i32
    %c0_i32_0 = arith.constant 0 : i32
    %c0_i32_1 = arith.constant 0 : i32
    return %arg1, %c0_i32, %c0_i32_0 : i32, i32, i32
  }
  func.func @transform_11(%arg0: i32, %arg1: i32) -> (i32, i32, i32) {
    %c0_i32 = arith.constant 0 : i32
    %c0_i32_0 = arith.constant 0 : i32
    %c0_i32_1 = arith.constant 0 : i32
    return %arg1, %c0_i32, %c0_i32_0 : i32, i32, i32
  }
  func.func @transform_12(%arg0: i32, %arg1: i32) -> (i32, i32, i32) {
    %c0_i32 = arith.constant 0 : i32
    %c0_i32_0 = arith.constant 0 : i32
    %c0_i32_1 = arith.constant 0 : i32
    return %arg1, %c0_i32, %c0_i32_0 : i32, i32, i32
  }
  func.func @transform_13(%arg0: i32, %arg1: i32) -> (i32, i32, i32) {
    %c0_i32 = arith.constant 0 : i32
    %c0_i32_0 = arith.constant 0 : i32
    %c0_i32_1 = arith.constant 0 : i32
    return %arg1, %c0_i32, %c0_i32_0 : i32, i32, i32
  }
  func.func @transform_14(%arg0: i32, %arg1: i32) -> (i32, i32, i32) {
    %c0_i32 = arith.constant 0 : i32
    %c0_i32_0 = arith.constant 0 : i32
    %c0_i32_1 = arith.constant 0 : i32
    return %arg0, %c0_i32, %c0_i32_0 : i32, i32, i32
  }
}

</mosaic_0001>

<bundles_post_ra>
// kernel: bert_classifier_forward.3
= control target key start
LH: loop header
LB: loop body
LE: loop exit
PB: predicated region body
PF: predicated region fallthrough
CT: control target
= control target key end

     0   :  { %vm18_vm0 = vcmask 261120   ;;  %s118_s0 = inlined_call_operand.vmem [shape: f32[16,32], index: 0, kind: input, shape index: {}]   ;;  %s119_s1 = inlined_call_operand.vmem [shape: f32[1,32], index: 1, kind: input, shape index: {}]   ;;  %s120_s2 = inlined_call_operand.vmem [shape: f32[1,32], index: 2, kind: input, shape index: {}]   ;;  %s121_s3 = inlined_call_operand.vmem [shape: f32[16,32], index: 3, kind: output, shape index: {}]  }
   0x1   :  { %v14_v0 = vld [vmem:[%s118_s0] sm:$0xff]  ;;  %v15_v1 = vld [vmem:[%s118_s0 + $0x8] sm:$0xff] }
   0x2   :  { %v19_v2 = vsel %vm18_vm0, %v14_v0, 0.0  ;;  %v22_v3 = vsel %vm18_vm0, %v15_v1, 0.0  ;;  %v68_v21 = vld [vmem:[%s119_s1] ss:$0 sm:$0xff] }
   0x3   :  { %20 = vadd.xlane.f32.xlu0 %v19_v2  ;;  %v69_v23 = vld [vmem:[%s120_s2] ss:$0 sm:$0xff] }
   0x7   :  { %23 = vadd.xlane.f32.xlu0 %v22_v3 }
  0x90   :  { %v21_v4 = vpop.xlane.xlu0 %20 }
  0x91   :  { %v26_v5 = vmul.f32 0.03125, %v21_v4 }
  0x93   :  { %v28_v6 = vsub.f32 %v14_v0, %v26_v5 }
  0x94   :  { %v24_v7 = vpop.xlane.xlu0 %23 }
  0x95   :  { %v27_v8 = vmul.f32 0.03125, %v24_v7  ;;  %v30_v9 = vmul.f32 %v28_v6, %v28_v6 }
  0x97   :  { %v29_v10 = vsub.f32 %v15_v1, %v27_v8  ;;  %v32_v11 = vsel %vm18_vm0, %v30_v9, 0.0 }
  0x98   :  { %33 = vadd.xlane.f32.xlu1 %v32_v11 }
  0x99   :  { %v31_v12 = vmul.f32 %v29_v10, %v29_v10 }
  0x9b   :  { %v35_v13 = vsel %vm18_vm0, %v31_v12, 0.0 }
  0x9c   :  { %36 = vadd.xlane.f32.xlu1 %v35_v13 }
 0x125   :  { %v34_v14 = vpop.xlane.xlu1 %33 }
 0x126   :  { %v38_v15 = vmul.f32 0.03125, %v34_v14 }
 0x128   :  { %v40_v16 = vadd.f32 1e-05, %v38_v15 }
 0x129   :  { %v37_v17 = vpop.xlane.xlu1 %36 }
 0x12a   :  { %70 = vrsqrt.f32 %v40_v16  ;;  %v39_v18 = vmul.f32 0.03125, %v37_v17 }
 0x12c   :  { %v41_v19 = vadd.f32 1e-05, %v39_v18 }
 0x12e   :  { %72 = vrsqrt.f32 %v41_v19 }
 0x134   :  { %v71_v20 = vpop.eup %70 }
 0x135   :  { %v44_v22 = vmul.f32 %v71_v20, %v28_v6 }
 0x137   :  { %v52_v24 = vmul.f32 %v68_v21, %v44_v22 }
 0x138   :  { %v73_v25 = vpop.eup %72 }
 0x139   :  { %v60_v26 = vadd.f32 %v69_v23, %v52_v24  ;;  %v45_v27 = vmul.f32 %v73_v25, %v29_v10 }
 0x13b   :  { %62 = vst.msk [vmem:[%s121_s3] sm:$0xff] %vm18_vm0, %v60_v26  ;;  %v53_v28 = vmul.f32 %v68_v21, %v45_v27 }
 0x13d   :  { %v61_v29 = vadd.f32 %v69_v23, %v53_v28 }
 0x13f   :  { %63 = vst.msk [vmem:[%s121_s3 + $0x8] sm:$0xff] %vm18_vm0, %v61_v29 }

// kernel: bert_classifier_forward.5
= control target key start
LH: loop header
LB: loop body
LE: loop exit
PB: predicated region body
PF: predicated region fallthrough
CT: control target
= control target key end

     0   :  { %v237_v1 = vmov 0.0   ;;  %vm238_vm0 = vmmov 0   ;;  %s305_s0 = inlined_call_operand.vmem [shape: f32[2,32], index: 0, kind: input, shape index: {}]   ;;  %s306_s1 = inlined_call_operand.vmem [shape: bf16[32,32], index: 1, kind: input, shape index: {}]   ;;  %s307_s2 = inlined_call_operand.vmem [shape: f32[1,32], index: 2, kind: input, shape index: {}]   ;;  %s308_s3 = inlined_call_operand.vmem [shape: bf16[32,128], index: 3, kind: input, shape index: {}]   ;;  %s309_s4 = inlined_call_operand.vmem [shape: f32[1,128], index: 4, kind: input, shape index: {}]   ;;  %s310_s5 = inlined_call_operand.hbm [shape: f32[2,128], index: 5, kind: output, shape index: {}]  }
   0x1   :  { %v207_v0 = vld [vmem:[%s306_s1] sm:$0xff]   ;;  %188 = vmatprep.subr.bf16.mxu0 %v237_v1  ;;  %196 = vmatprep.subr.bf16.mxu1 %v237_v1  ;;  %v208_v2 = vld [vmem:[%s306_s1 + $0x8] sm:$0xff]  }
   0x2   :  { %189 = vmatpush3.bf16.msra.mxu0 %v207_v0  ;;  %192 = vmatprep.mubr.msk.bf16.mxu0 %vm238_vm0, %v237_v1  ;;  %v22_v3 = vld [vmem:[%s305_s0] sm:$0x3] }
   0x3   :  { %190 = vmatprep.subr.bf16.mxu0 %v237_v1  ;;  %200 = vmatprep.mubr.msk.bf16.mxu1 %vm238_vm0, %v237_v1 }
   0x4   :  { %10 = vsyncpa [#allocation3], 0  ;;  %v23_v4 = vpack.c.bf16 %v22_v3, %v22_v3  ;;  %vm47_vm1 = vcmask 261120   ;;  %v209_v5 = vld [vmem:[%s308_s3] sm:$0xff]   ;;  %v210_v6 = vld [vmem:[%s308_s3 + $0x8] sm:$0xff]   ;;  %s239_s3 = smov [#allocation2]  }
   0x5   :  { %197 = vmatpush3.bf16.msra.mxu1 %v209_v5  ;;  %v174_v7 = vld [vmem:[%s307_s2] ss:$0 sm:$0xff]  ;;  %s166_s30 = sshll.u32 %s239_s3, 4  ;;  %s167_s30 = int_to_ptr.vmem [resolvable:$true] %s166_s30 }
   0x6   :  { %191 = vmatpush3.bf16.msra.mxu0 %v208_v2  ;;  %198 = vmatprep.subr.bf16.mxu1 %v237_v1  ;;  %v178_v15 = vld [vmem:[%s309_s4] ss:$0 sm:$0xff]  ;;  %s213_s2 = scalar_lea.vmem %s167_s30, 32  ;;  %p218_p1 = scmp.lt.s32.totalorder %s167_s30, %s167_s30 }
   0x7   :  { %p214_p0 = scmp.ne.s32.totalorder %s167_s30, %s213_s2  ;;  %p219_p2 = scmp.lt.s32.totalorder %s213_s2, %s213_s2 }
   0x9   :  { %193 = vmatmul.mubr.msk.bf16.vlgmr.msra.gmra.mrb[0].mxu0 %vm47_vm1, %v23_v4  ;;  %199 = vmatpush3.bf16.msra.mxu1 %v210_v6  ;;  %p220_p3 = por %p219_p2, %p218_p1 }
   0xb   :  { %p221_p4 = pnand %p220_p3, %p214_p0 }
  0xdc   :  { %v85_v8 = vpop.f32.mrb[0].mxu0 }
  0xdd   :  { %v86_v9 = vadd.f32 %v174_v7, %v85_v8  ;;  %v194_v10 = vpop.f32.mrb[1].mxu0 }
  0xde   :  { %v88_v11 = vpop.f32.mrb[2].mxu0 }
  0xdf   :  { %211 = vtanh.f32 %v86_v9  ;;  %v195_v12 = vpop.f32.mrb[3].mxu0 }
  0xe9   :  { %v212_v13 = vpop.eup %211 }
  0xea   :  { %v92_v14 = vpack.c.bf16 %v212_v13, %v212_v13 }
  0xec   :  { %201 = vmatmul.mubr.msk.bf16.vlgmr.msra.gmra.mrb[0].mxu1 %vm47_vm1, %v92_v14 }
 0x1bf   :  { %v153_v16 = vpop.f32.mrb[0].mxu1 }
 0x1c0   :  { %v154_v17 = vadd.f32 %v178_v15, %v153_v16  ;;  %v202_v18 = vpop.f32.mrb[1].mxu1 }
 0x1c1   :  { %v156_v19 = vpop.f32.mrb[2].mxu1 }
 0x1c2   :  { %159 = vst [vmem:[#allocation2] sm:$0x3] %v154_v17  ;;  %v203_v20 = vpop.f32.mrb[3].mxu1 }
 0x1c3   :  { %224 = shalt.err (!%p221_p4)
}
 0x1c4   :  { %s225_s4 = scalar_lea.hbm %s310_s5, 32 }
 0x1c5   :  { %p226_p5 = scmp.ne.s32.totalorder %s310_s5, %s225_s4  ;;  %p229_p6 = scmp.lt.u32.totalorder %s225_s4, %s310_s5 }
 0x1c7   :  { %p231_p7 = pnand %p229_p6, %p226_p5 }
 0x1c9   :  { %234 = shalt.err (!%p231_p7)
}
 0x1ca   :  { %169 = dma.vmem_to_hbm [thread:$0]  %s167_s30, 32, %s310_s5, [#allocation3]  }
 0x1cb   :  { %235 = dma.done.wait [#allocation3], 32  }
 0x1cc   :  { %236 = vsyncadd [#allocation3], 4294967264 }
 0x1cd   :  { %173 = vsyncpa [#allocation3], 1 }

// kernel: bert_classifier_forward.4
= control target key start
LH: loop header
LB: loop body
LE: loop exit
PB: predicated region body
PF: predicated region fallthrough
CT: control target
= control target key end

     0   :  { %s1821_s29 = smov 0   ;;  %s1823_s30 = smov 0   ;;  %s2061_s0 = inlined_call_operand.vmem [shape: f32[2,8,32], index: 0, kind: input, shape index: {}]   ;;  %s2062_s1 = inlined_call_operand.vmem [shape: f32[2,1,8], index: 1, kind: input, shape index: {}]   ;;  %s2063_s2 = inlined_call_operand.vmem [shape: bf16[2,32,96], index: 2, kind: input, shape index: {}]   ;;  %s2064_s3 = inlined_call_operand.vmem [shape: f32[2,1,96], index: 3, kind: input, shape index: {}]   ;;  %s2065_s4 = inlined_call_operand.vmem [shape: bf16[2,32,32], index: 4, kind: input, shape index: {}]   ;;  %s2066_s5 = inlined_call_operand.vmem [shape: f32[2,1,32], index: 5, kind: input, shape index: {}]   ;;  %s2067_s6 = inlined_call_operand.vmem [shape: f32[2,1,32], index: 6, kind: input, shape index: {}]   ;;  %s2068_s7 = inlined_call_operand.vmem [shape: f32[2,1,32], index: 7, kind: input, shape index: {}]   ;;  %s2069_s8 = inlined_call_operand.vmem [shape: bf16[2,32,64], index: 8, kind: input, shape index: {}]   ;;  %s2070_s9 = inlined_call_operand.vmem [shape: f32[2,1,64], index: 9, kind: input, shape index: {}]   ;;  %s2071_s10 = inlined_call_operand.vmem [shape: bf16[2,64,32], index: 10, kind: input, shape index: {}]   ;;  %s2072_s11 = inlined_call_operand.vmem [shape: f32[2,1,32], index: 11, kind: input, shape index: {}]   ;;  %s2073_s12 = inlined_call_operand.vmem [shape: f32[2,1,32], index: 12, kind: input, shape index: {}]   ;;  %s2074_s13 = inlined_call_operand.vmem [shape: f32[2,1,32], index: 13, kind: input, shape index: {}]   ;;  %s2075_s14 = inlined_call_operand.vmem [shape: f32[2,1,32], index: 14, kind: output, shape index: {}]  }
   0x1   :  { %2080 = sst [smem:[#allocation14_spill]] %s2061_s0  ;;  %s1825_s15 = smov 0  }
   0x2   :  { %2081 = sst [smem:[#allocation15_spill]] %s2062_s1  ;;  %s1827_s16 = smov 0  }
   0x3   :  { %2082 = sst [smem:[#allocation16_spill]] %s2063_s2  ;;  %s1829_s17 = smov 0  }
   0x4   :  { %2083 = sst [smem:[#allocation17_spill]] %s2065_s4 }
   0x5   :  { %2084 = sst [smem:[#allocation18_spill]] %s2067_s6 }
   0x6   :  { %2085 = sst [smem:[#allocation19_spill]] %s2068_s7 }
   0x7   :  { %2086 = sst [smem:[#allocation20_spill]] %s2069_s8 }
   0x8   :  { %2087 = sst [smem:[#allocation21_spill]] %s2070_s9 }
   0x9   :  { %2088 = sst [smem:[#allocation22_spill]] %s2073_s12 }
   0xa   :  { %2089 = sst [smem:[#allocation23_spill]] %s2074_s13 }
   0xb   :  { %2090 = sst [smem:[#allocation24_spill]] %s2075_s14 }
   0xc LB: > { %2091 = sst [smem:[#allocation8_spill]] %s1706_s29  ;;  %s33_s18 = sadd.s32 1, %s1714_s15  ;;  %s1722_s17 = sphi %s1829_s17, %s24_s17   ;;  %s1718_s16 = sphi %s1827_s16, %s2125_s16   ;;  %s1714_s15 = sphi %s1825_s15, %s2124_s15   ;;  %s1710_s30 = sphi %s1823_s30, %s2123_s30   ;;  %s1706_s29 = sphi %s1821_s29, %s2122_s29  }
   0xd   : > { %2092 = sst [smem:[#allocation9_spill]] %s1714_s15  ;;  %s36_s19 = sadd.s32 1, %s1718_s16 }
   0xe   : > { %2093 = sst [smem:[#allocation10_spill]] %s1718_s16  ;;  %p34_p0 = scmp.ge.s32.totalorder %s33_s18, 2 }
   0xf   : > { %2094 = sst [smem:[#allocation11_spill]] %s1722_s17  ;;  %p1477_p1 = scmp.ge.s32.totalorder %s1722_s17, 1 }
  0x10   : > { %p535_p2 = scmp.lt.s32.totalorder %s1722_s17, 5  ;;  %s2127_s18 = smov (%p34_p0, %s33_s18), 0 }
  0x11   : > { %2095 = sst [smem:[#allocation12_spill]] %s2127_s18  ;;  %s2129_s19 = smov (!%p34_p0, %s36_s19), %s1718_s16 }
  0x12   : > { %p536_p3 = pnand %p1477_p1, %p535_p2  ;;  %p38_p4 = scmp.ge.s32.totalorder %s2129_s19, 2 }
  0x13   : > { %p625_p5 = scmp.lt.s32.totalorder (!%p536_p3), %s1710_s30, 1  ;;  %p632_p6 = scmp.lt.s32.totalorder (!%p536_p3), %s1706_s29, 1 }
  0x14   : > { %s2131_s19 = smov (%p38_p4, %s2129_s19), 0  ;;  %539 = sbr.rel (%p536_p3) target bundleno = 2599 (0xa27), region = 76 }
  0x15   : > { %2096 = sst [smem:[#allocation13_spill]] %s2131_s19  ;;  %s2097_s1 = sld [smem:[#allocation15_spill]] (!%p536_p3) }
  0x16   : > { %s2098_s0 = sld [smem:[#allocation14_spill]] (!%p536_p3)  ;;  %s2099_s2 = sld [smem:[#allocation16_spill]] (!%p536_p3) }
  0x17   : > { %s2100_s4 = sld [smem:[#allocation17_spill]] (!%p536_p3)  ;;  %s2103_s8 = sld [smem:[#allocation20_spill]] (!%p536_p3) }
  0x18   : > { %s2105_s19 = sld [smem:[#allocation22_spill]] (!%p536_p3)  ;;  %s2108_s6 = sld [smem:[#allocation8_spill]] (!%p536_p3) }
  0x1b   : > { %s2133_s30 = smov (!%p625_p5, %s1710_s30), 1 }
  0x1c   : > { %s1857_s20 = scalar_select %p632_p6, %s1706_s29, 1 }
  0x1d   : > { %s1478_s21 = sshll.u32 %s2133_s30, 3  ;;  %s631_s24 = scalar_lea.vmem %s2097_s1, %s2133_s30 }
  0x1e   : > { %s628_s27 = scalar_lea.vmem %s2098_s0, %s1478_s21  ;;  %s1522_s28 = sshll.u32 %s1857_s20, 4 }
  0x1f   : > { %s636_s16 = scalar_lea.vmem %s2099_s2, %s1522_s28  ;;  %s1878_s22 = scalar_lea.vmem %s2100_s4, %s1522_s28 }
  0x20   : > { %s1895_s17 = scalar_lea.vmem %s2103_s8, %s1522_s28  ;;  %s1525_s4 = sshll.u32 %s1857_s20, 5 }
  0x21   : > { %s669_s25 = scalar_lea.vmem %s2072_s11, %s1857_s20  ;;  %s1909_s0 = scalar_lea.vmem %s2071_s10, %s1525_s4 }
  0x22   : > { %s672_s2 = scalar_lea.vmem %s2105_s19, %s1857_s20  ;;  %s2106_s8 = sld [smem:[#allocation23_spill]] }
  0x23   : > { %s2107_s29 = sld [smem:[#allocation24_spill]]  ;;  %p1487_p7 = scmp.ne.s32.totalorder %s2108_s6, 0 }
  0x24   : > { %v684_v0 = vld [vmem:[%s628_s27] sm:$0xff] (!%p1487_p7)  ;;  %vm685_vm0 = vcmask (!%p1487_p7), 261120  }
  0x25   : > { %683 = sbr.rel (%p1487_p7) target bundleno = 44 (0x2c), region = 80  ;;  %686 = vst.msk [vmem:[#allocation2] sm:$0xff] (!%p1487_p7), %vm685_vm0, %v684_v0 }
  0x28   : > { %s675_s7 = scalar_lea.vmem %s2106_s8, %s1857_s20 }
  0x29   : > { %s678_s9 = scalar_lea.vmem %s2107_s29, %s2133_s30 }
  0x2c PF: > { %v1924_v1 = vld [vmem:[%s631_s24] ss:$0 sm:$0xff]  ;;  %v1728_v3 = vmov 0.0   ;;  %v1661_v4 = vld [vmem:[%s636_s16 + $0x8] sm:$0xff]   ;;  %vm1729_vm1 = vmmov 0   ;;  %vm719_vm2 = vcmask 261120   ;;  %s2109_s8 = scalar_lea.vmem %s2064_s3, %s1857_s20 }
  0x2d   : > { %v1660_v2 = vld [vmem:[%s636_s16] sm:$0xff]   ;;  %1546 = vmatprep.subr.bf16.mxu0 %v1728_v3  ;;  %1550 = vmatprep.mubr.msk.bf16.mxu0 %vm1729_vm1, %v1728_v3  ;;  %vm766_vm3 = vcmask 60416   ;;  %s1730_s29 = smov 88   ;;  %s1731_s16 = smov 96  }
  0x2e   : > { %1547 = vmatpush3.bf16.msra.mxu0 %v1660_v2  ;;  %v1927_v5 = vld [vmem:[#allocation2] sm:$0xff]  ;;  %s1732_s24 = smov 48   ;;  %s1733_s27 = smov 64  }
  0x2f   : > { %1548 = vmatprep.subr.bf16.mxu0 %v1728_v3  ;;  %v695_v6 = vpack.c.bf16 %v1927_v5, %v1927_v5  ;;  %v1489_v7 = vld [vmem:[%s2109_s8] ss:$0 sm:$0xff]  ;;  %s1734_s19 = smov 56   ;;  %s1735_s1 = smov 120  }
  0x30   : > { %s1736_s23 = smov 80   ;;  %s1737_s26 = smov 112  }
  0x31   : > { %s1738_s21 = smov 104   ;;  %s1739_s12 = smov 72  }
  0x32   : > { %1549 = vmatpush3.bf16.msra.mxu0 %v1661_v4  ;;  %s1740_s18 = smov 40   ;;  %s1952_s28 = smov 0  }
  0x35   : > { %1551 = vmatmul.mubr.msk.bf16.vlgmr.msra.gmra.mrb[0].mxu0 %vm719_vm2, %v695_v6 }
 0x108   : > { %v757_v8 = vpop.f32.mrb[0].mxu0 }
 0x109   : > { %v758_v9 = vadd.f32 %v1489_v7, %v757_v8  ;;  %v1552_v10 = vpop.f32.mrb[1].mxu0 }
 0x10a   : > { %v760_v11 = vpop.f32.mrb[2].mxu0 }
 0x10b   : > { %v763_v12 = vmul.f32 0.35355338, %v758_v9  ;;  %v1526_v13 = vpack.c.bf16 %v758_v9, %v758_v9  ;;  %v1553_v14 = vpop.f32.mrb[3].mxu0 }
 0x10d   : > { %v764_v15 = vpack.c.bf16 %v763_v12, %v763_v12  ;;  %787 = vrot.lane.b32.xlu1 %v1526_v13, %s1730_s29  ;;  %771 = vrot.lane.b32.xlu0 %v1526_v13, %s1731_s16 }
 0x10f   : > { %767 = vst.msk [vmem:[#allocation3] sm:$0xf] %vm766_vm3, %v764_v15 }
 0x111   : > { %807 = vrot.lane.b32.xlu1 %v1526_v13, %s1732_s24  ;;  %775 = vrot.lane.b32.xlu0 %v1526_v13, %s1733_s27 }
 0x115   : > { %792 = vrot.lane.b32.xlu0 %v1526_v13, %s1734_s19  ;;  %782 = vrot.lane.b32.xlu1 %v764_v15, %s1735_s1 }
 0x119   : > { %802 = vrot.lane.b32.xlu0 %v1526_v13, %s1736_s23  ;;  %797 = vrot.lane.b32.xlu1 %v764_v15, %s1737_s26 }
 0x11d   : > { %812 = vrot.lane.b32.xlu0 %v764_v15, %s1738_s21  ;;  %817 = vrot.lane.b32.xlu1 %v1526_v13, %s1739_s12 }
 0x121   : > { %822 = vrot.lane.b32.xlu0 %v1526_v13, %s1740_s18 }
 0x17f   : > { %v788_v16 = vpop.permute.xlu1 %787  ;;  %v772_v17 = vpop.permute.xlu0 %771 }
 0x180   : > { %791 = vst.msk [vmem:[#allocation4 + $0x4] sm:$0xf] %vm766_vm3, %v788_v16  ;;  %774 = vst.msk [vmem:[#allocation4] sm:$0xf] %vm766_vm3, %v772_v17 }
 0x183   : > { %v808_v18 = vpop.permute.xlu1 %807  ;;  %v776_v19 = vpop.permute.xlu0 %775 }
 0x184   : > { %811 = vst.msk [vmem:[#allocation5 + $0x8] sm:$0xf] %vm766_vm3, %v808_v18  ;;  %778 = vst.msk [vmem:[#allocation5] sm:$0xf] %vm766_vm3, %v776_v19 }
 0x187   : > { %v793_v20 = vpop.permute.xlu0 %792  ;;  %v783_v21 = vpop.permute.xlu1 %782 }
 0x188   : > { %796 = vst.msk [vmem:[#allocation5 + $0x4] sm:$0xf] %vm766_vm3, %v793_v20  ;;  %786 = vst.msk [vmem:[#allocation3 + $0x4] sm:$0xf] %vm766_vm3, %v783_v21 }
 0x18b   : > { %v803_v22 = vpop.permute.xlu0 %802  ;;  %v798_v23 = vpop.permute.xlu1 %797 }
 0x18c   : > { %806 = vst.msk [vmem:[#allocation4 + $0x8] sm:$0xf] %vm766_vm3, %v803_v22  ;;  %801 = vst.msk [vmem:[#allocation3 + $0x8] sm:$0xf] %vm766_vm3, %v798_v23 }
 0x18f   : > { %v813_v24 = vpop.permute.xlu0 %812  ;;  %v818_v25 = vpop.permute.xlu1 %817 }
 0x190   : > { %816 = vst.msk [vmem:[#allocation3 + $0xc] sm:$0xf] %vm766_vm3, %v813_v24  ;;  %821 = vst.msk [vmem:[#allocation4 + $0xc] sm:$0xf] %vm766_vm3, %v818_v25 }
 0x193   : > { %v823_v26 = vpop.permute.xlu0 %822 }
 0x194   : > { %826 = vst.msk [vmem:[#allocation5 + $0xc] sm:$0xf] %vm766_vm3, %v823_v26 }
 0x195 LB: >> { %v1741_v27 = vmov 0.0   ;;  %vm1742_vm4 = vmmov 0   ;;  %s1958_s15 = sshll.u32 %s1726_s28, 2  ;;  %vm842_vm5 = vcmask 64512   ;;  %vm904_vm6 = vcmask 1043456   ;;  %s832_s28 = sadd.s32 1, %s1726_s28   ;;  %s1726_s28 = sphi %s1952_s28, %s832_s28  }
 0x196   : >> { %1554 = vmatprep.subr.bf16.mxu0 %v1741_v27  ;;  %1556 = vmatprep.mubr.msk.bf16.mxu0 %vm1742_vm4, %v1741_v27  ;;  %s837_s13 = scalar_lea.vmem [#allocation4], %s1958_s15  ;;  %s834_s14 = scalar_lea.vmem [#allocation3], %s1958_s15 }
 0x197   : >> { %1560 = vmatprep.subr.bf16.mxu1 %v1741_v27  ;;  %1562 = vmatprep.mubr.msk.bf16.mxu1 %vm1742_vm4, %v1741_v27  ;;  %v838_v28 = vld [vmem:[%s837_s13] sm:$0xf]  ;;  %s840_s4 = scalar_lea.vmem [#allocation5], %s1958_s15  ;;  %s950_s6 = scalar_lea.vmem [#allocation6], %s1958_s15 }
 0x198   : >> { %v847_v29 = vsel %vm842_vm5, %v838_v28, 0  ;;  %v835_v30 = vld [vmem:[%s834_s14] sm:$0xf]  ;;  %p829_p8 = scmp.ge.s32.totalorder %s832_s28, 4  }
 0x199   : >> { %1555 = vmatpush3.bf16.xpose.msra.mxu0 %v847_v29  ;;  %s1743_s8 = smov (%p829_p8), 8   ;;  %s1744_s29 = smov (%p829_p8), 24   ;;  %v1666_v57 = vld [vmem:[%s1878_s22] sm:$0xff] (%p829_p8)   ;;  %v1667_v58 = vld [vmem:[%s1878_s22 + $0x8] sm:$0xff] (%p829_p8)   ;;  %vm960_vm7 = vcmask (%p829_p8), 126016   ;;  %vm968_vm8 = vcmask (%p829_p8), 191616  }
 0x19a   : > { %1582 = vmatprep.subr.bf16.mxu0 (%p829_p8), %v1728_v3  ;;  %s1745_s16 = smov (%p829_p8), 16   ;;  %vm976_vm9 = vcmask (%p829_p8), 257216   ;;  %s2110_s27 = scalar_lea.vmem (%p829_p8), %s2066_s5, %s1857_s20  ;;  %v1668_v14 = vld [vmem:[%s1895_s17] sm:$0xff] (%p829_p8)   ;;  %v1669_v15 = vld [vmem:[%s1895_s17 + $0x8] sm:$0xff] (%p829_p8)   ;;  %v1672_v27 = vld [vmem:[%s1909_s0 + $0x10] sm:$0xff] (%p829_p8)   ;;  %vm1192_vm10 = vcmask (%p829_p8), 523264  }
 0x19b   : >> { %v841_v42 = vld [vmem:[%s840_s4] sm:$0xf]  ;;  %s2111_s23 = sld [smem:[#allocation18_spill]] (%p829_p8)  ;;  %s2113_s17 = sld [smem:[#allocation19_spill]] (%p829_p8)  ;;  %v1671_v26 = vld [vmem:[%s1909_s0 + $0x8] sm:$0xff] (%p829_p8)   ;;  %v1673_v28 = vld [vmem:[%s1909_s0 + $0x18] sm:$0xff] (%p829_p8)  }
 0x19c   : >> { %v906_v43 = vsel %vm904_vm6, %v841_v42, 0  ;;  %v1501_v63 = vld [vmem:[%s2110_s27] ss:$0 sm:$0xff] (%p829_p8)  ;;  %s2115_s13 = sld [smem:[#allocation21_spill]] (%p829_p8)  ;;  %s2119_s24 = sld [smem:[#allocation8_spill]] (%p829_p8) }
 0x19d   : >> { %1561 = vmatpush3.bf16.msra.mxu1 %v906_v43  ;;  %v1670_v25 = vld [vmem:[%s1909_s0] sm:$0xff] (%p829_p8)  }
 0x19e   : > { %1566 = vmatprep.subr.bf16.mxu1 (%p829_p8), %v1728_v3 }
 0x1a0   : >> { %1557 = vmatmul.mubr.msk.bf16.vlgmr.msra.gmra.mrb[0].mxu0 %vm842_vm5, %v835_v30 }
 0x1a1   : > { %1590 = vmatprep.mubr.msk.bf16.mxu0 (%p829_p8), %vm1729_vm1, %v1728_v3  ;;  %s2112_s26 = scalar_lea.vmem (%p829_p8), %s2111_s23, %s1857_s20  ;;  %s2114_s18 = scalar_lea.vmem (%p829_p8), %s2113_s17, %s1857_s20  ;;  %1583 = vmatpush3.bf16.msra.mxu0 (%p829_p8), %v1670_v25 }
 0x1a2   : > { %v1505_v19 = vld [vmem:[%s2112_s26] ss:$0 sm:$0xff] (%p829_p8)  ;;  %1584 = vmatprep.subr.bf16.mxu0 (%p829_p8), %v1728_v3  ;;  %s2116_s14 = scalar_lea.vmem (%p829_p8), %s2115_s13, %s1857_s20  ;;  %p1519_p9 = scmp.ne.s32.totalorder (%p829_p8), %s2119_s24, 1 }
 0x1a3   : > { %v1506_v21 = vld [vmem:[%s2114_s18] ss:$0 sm:$0xff] (%p829_p8) }
 0x1a4   : > { %v1507_v29 = vld [vmem:[%s2116_s14] ss:$0 sm:$0xff] (%p829_p8) }
 0x1a5   : > { %1585 = vmatpush3.bf16.msra.mxu0 (%p829_p8), %v1671_v26 }
 0x1a6   : > { %1586 = vmatprep.subr.bf16.mxu0 (%p829_p8), %v1728_v3 }
 0x1a9   : > { %1587 = vmatpush3.bf16.msra.mxu0 (%p829_p8), %v1672_v27 }
 0x1aa   : > { %1588 = vmatprep.subr.bf16.mxu0 (%p829_p8), %v1728_v3 }
 0x1ad   : > { %1589 = vmatpush3.bf16.msra.mxu0 (%p829_p8), %v1673_v28 }
 0x273   : >> { %v883_v31 = vpop.f32.mrb[0].mxu0 }
 0x274   : >> { %v884_v32 = vadd.f32 %v1924_v1, %v883_v31  ;;  %v1558_v33 = vpop.f32.mrb[1].mxu0 }
 0x275   : >> { %v886_v34 = vpop.f32.mrb[2].mxu0 }
 0x276   : >> { %v1559_v35 = vpop.f32.mrb[3].mxu0  ;;  %v889_v36 = vsel %vm842_vm5, %v884_v32, -inf }
 0x277   : >> { %890 = vmax.xlane.f32.xlu0 %v889_v36 }
 0x304   : >> { %v891_v37 = vpop.xlane.xlu0 %890 }
 0x305   : >> { %v892_v38 = vsub.f32 %v884_v32, %v891_v37 }
 0x307   : >> { %v893_v39 = vmul.f32 1.442695, %v892_v38 }
 0x309   : >> { %1662 = vpow2.f32 %v893_v39 }
 0x313   : >> { %v1663_v40 = vpop.eup %1662 }
 0x314   : >> { %v895_v41 = vsel %vm842_vm5, %v1663_v40, 0.0 }
 0x315   : >> { %896 = vadd.xlane.f32.xlu0 %v895_v41 }
 0x3a2   : >> { %v897_v44 = vpop.xlane.xlu0 %896 }
 0x3a3   : >> { %1664 = vrcp.f32 %v897_v44  ;;  %v1511_v44 = vld [vmem:[%s669_s25] ss:$0 sm:$0xff] (%p829_p8) }
 0x3ad   : >> { %v1665_v45 = vpop.eup %1664 }
 0x3ae   : >> { %v899_v46 = vmul.f32 %v1665_v45, %v1663_v40 }
 0x3b0   : >> { %v900_v47 = vpack.c.bf16 %v899_v46, %v899_v46 }
 0x3b2   : >> { %1563 = vmatmul.mubr.msk.bf16.vlgmr.msra.gmra.mrb[0].mxu1 %vm842_vm5, %v900_v47 }
 0x3b3   : > { %1570 = vmatprep.mubr.msk.bf16.mxu1 (%p829_p8), %vm1729_vm1, %v1728_v3  ;;  %1567 = vmatpush3.bf16.msra.mxu1 (%p829_p8), %v1666_v57 }
 0x3b4   : > { %1568 = vmatprep.subr.bf16.mxu1 (%p829_p8), %v1728_v3 }
 0x3b7   : > { %1569 = vmatpush3.bf16.msra.mxu1 (%p829_p8), %v1667_v58 }
 0x3b8   : > { %1574 = vmatprep.subr.bf16.mxu1 (%p829_p8), %v1728_v3 }
 0x482   : > { %831 = sbr.rel (!%p829_p8) target bundleno = 405 (0x195), region = 176 }
 0x485   : >> { %v942_v48 = vpop.f32.mrb[0].mxu1 }
 0x486   : >> { %v948_v49 = vpack.c.bf16 %v942_v48, %v942_v48  ;;  %v1564_v50 = vpop.f32.mrb[1].mxu1 }
 0x487   : >> { %v945_v51 = vpop.f32.mrb[2].mxu1 }
 0x488   : >> { %951 = vst.msk [vmem:[%s950_s6] sm:$0xf] %vm766_vm3, %v948_v49  ;;  %v1565_v52 = vpop.f32.mrb[3].mxu1 }
 0x489   : > { %vm1271_vm11 = vcmask (!%p1519_p9), 253952  }
 0x48f   : > { %v955_v53 = vld [vmem:[#allocation6 + $0x4] sm:$0xf]  ;;  %v963_v54 = vld [vmem:[#allocation6 + $0x8] sm:$0xf]  ;;  %v971_v55 = vld [vmem:[#allocation6 + $0xc] sm:$0xf] }
 0x490   : > { %957 = vrot.lane.b32.xlu0 %v955_v53, %s1743_s8  ;;  %v952_v56 = vld [vmem:[#allocation6] sm:$0xf]  ;;  %973 = vrot.lane.b32.xlu1 %v971_v55, %s1744_s29 }
 0x491   : > { %953 = vst.msk [vmem:[#allocation7] sm:$0xf] %vm766_vm3, %v952_v56 }
 0x494   : > { %965 = vrot.lane.b32.xlu0 %v963_v54, %s1745_s16 }
 0x502   : > { %v958_v59 = vpop.permute.xlu0 %957  ;;  %v974_v60 = vpop.permute.xlu1 %973 }
 0x503   : > { %961 = vst.msk [vmem:[#allocation7] sm:$0xf] %vm960_vm7, %v958_v59 }
 0x506   : > { %v966_v61 = vpop.permute.xlu0 %965 }
 0x507   : > { %969 = vst.msk [vmem:[#allocation7] sm:$0xf] %vm968_vm8, %v966_v61  ;;  %v1517_v61 = vld [vmem:[%s672_s2] ss:$0 sm:$0xff] }
 0x508   : > { %977 = vst.msk [vmem:[#allocation7] sm:$0xf] %vm976_vm9, %v974_v60 }
 0x50f   : > { %v978_v62 = vld [vmem:[#allocation7] sm:$0xf] }
 0x510   : > { %1571 = vmatmul.mubr.msk.bf16.vlgmr.msra.gmra.mrb[0].mxu1 %vm719_vm2, %v978_v62 }
 0x511   : > { %1578 = vmatprep.mubr.msk.bf16.mxu1 %vm1729_vm1, %v1728_v3  ;;  %1575 = vmatpush3.bf16.msra.mxu1 %v1668_v14 }
 0x512   : > { %1576 = vmatprep.subr.bf16.mxu1 %v1728_v3 }
 0x515   : > { %1577 = vmatpush3.bf16.msra.mxu1 %v1669_v15 }
 0x5e3   : > { %v1039_v0 = vpop.f32.mrb[0].mxu1 }
 0x5e4   : > { %v1040_v1 = vadd.f32 %v1501_v63, %v1039_v0  ;;  %v1572_v2 = vpop.f32.mrb[1].mxu1  ;;  %v1518_v63 = vld [vmem:[%s675_s7] ss:$0 sm:$0xff] }
 0x5e5   : > { %v1042_v4 = vpop.f32.mrb[2].mxu1 }
 0x5e6   : > { %v1045_v6 = vadd.f32 %v1040_v1, %v1927_v5  ;;  %v1573_v7 = vpop.f32.mrb[3].mxu1 }
 0x5e8   : > { %v1048_v8 = vsel %vm719_vm2, %v1045_v6, 0.0 }
 0x5e9   : > { %1049 = vadd.xlane.f32.xlu1 %v1048_v8 }
 0x676   : > { %v1050_v9 = vpop.xlane.xlu1 %1049 }
 0x677   : > { %v1052_v10 = vmul.f32 0.03125, %v1050_v9 }
 0x679   : > { %v1053_v11 = vsub.f32 %v1045_v6, %v1052_v10 }
 0x67b   : > { %v1054_v12 = vmul.f32 %v1053_v11, %v1053_v11 }
 0x67d   : > { %v1055_v13 = vsel %vm719_vm2, %v1054_v12, 0.0 }
 0x67e   : > { %1056 = vadd.xlane.f32.xlu0 %v1055_v13 }
 0x70b   : > { %v1057_v5 = vpop.xlane.xlu0 %1056 }
 0x70c   : > { %v1058_v16 = vmul.f32 0.03125, %v1057_v5 }
 0x70e   : > { %v1059_v17 = vadd.f32 1e-05, %v1058_v16 }
 0x710   : > { %1674 = vrsqrt.f32 %v1059_v17 }
 0x71a   : > { %v1675_v18 = vpop.eup %1674 }
 0x71b   : > { %v1061_v20 = vmul.f32 %v1675_v18, %v1053_v11 }
 0x71d   : > { %v1068_v22 = vmul.f32 %v1505_v19, %v1061_v20 }
 0x71f   : > { %v1075_v23 = vadd.f32 %v1506_v21, %v1068_v22 }
 0x721   : > { %v1076_v24 = vpack.c.bf16 %v1075_v23, %v1075_v23 }
 0x723   : > { %1579 = vmatmul.mubr.msk.bf16.vlgmr.msra.gmra.mrb[4].mxu1 %vm719_vm2, %v1076_v24 }
 0x7f6   : > { %v1137_v30 = vpop.f32.mrb[4].mxu1 }
 0x7f7   : > { %v1138_v31 = vadd.f32 %v1507_v29, %v1137_v30  ;;  %v1580_v32 = vpop.f32.mrb[5].mxu1 }
 0x7f8   : > { %v1140_v33 = vpop.f32.mrb[6].mxu1 }
 0x7f9   : > { %v1144_v34 = vmul.f32 0.044715, %v1138_v31  ;;  %v1581_v35 = vpop.f32.mrb[7].mxu1  ;;  %v1143_v3 = vmul.f32 0.5, %v1138_v31 }
 0x7fb   : > { %v1145_v36 = vmul.f32 %v1144_v34, %v1138_v31 }
 0x7fd   : > { %v1146_v37 = vmul.f32 %v1145_v36, %v1138_v31 }
 0x7ff   : > { %v1147_v38 = vadd.f32 %v1146_v37, %v1138_v31 }
 0x801   : > { %v1148_v39 = vmul.f32 0.7978846, %v1147_v38 }
 0x803   : > { %1676 = vtanh.f32 %v1148_v39 }
 0x80d   : > { %v1677_v40 = vpop.eup %1676 }
 0x80e   : > { %v1150_v41 = vadd.f32 1.0, %v1677_v40 }
 0x810   : > { %v1151_v42 = vmul.f32 %v1150_v41, %v1143_v3 }
 0x812   : > { %v1152_v43 = vpack.c.bf16 %v1151_v42, %v1151_v42 }
 0x814   : > { %1591 = vmatmul.mubr.msk.bf16.vlgmr.msra.gmra.mrb[0].mxu0 %vm1192_vm10, %v1152_v43 }
 0x8e7   : > { %v1230_v45 = vpop.f32.mrb[0].mxu0 }
 0x8e8   : > { %v1231_v46 = vadd.f32 %v1511_v44, %v1230_v45  ;;  %v1592_v47 = vpop.f32.mrb[1].mxu0 }
 0x8e9   : > { %v1233_v48 = vpop.f32.mrb[2].mxu0 }
 0x8ea   : > { %v1593_v49 = vpop.f32.mrb[3].mxu0  ;;  %v1236_v50 = vadd.f32 %v1231_v46, %v1075_v23 }
 0x8ec   : > { %v1239_v51 = vsel %vm719_vm2, %v1236_v50, 0.0 }
 0x8ed   : > { %1240 = vadd.xlane.f32.xlu0 %v1239_v51 }
 0x97a   : > { %v1241_v52 = vpop.xlane.xlu0 %1240 }
 0x97b   : > { %v1242_v53 = vmul.f32 0.03125, %v1241_v52 }
 0x97d   : > { %v1243_v54 = vsub.f32 %v1236_v50, %v1242_v53 }
 0x97f   : > { %v1244_v55 = vmul.f32 %v1243_v54, %v1243_v54 }
 0x981   : > { %v1245_v56 = vsel %vm719_vm2, %v1244_v55, 0.0 }
 0x982   : > { %1246 = vadd.xlane.f32.xlu1 %v1245_v56 }
 0xa0f   : > { %v1247_v57 = vpop.xlane.xlu1 %1246 }
 0xa10   : > { %v1248_v58 = vmul.f32 0.03125, %v1247_v57 }
 0xa12   : > { %v1249_v59 = vadd.f32 1e-05, %v1248_v58 }
 0xa14   : > { %1678 = vrsqrt.f32 %v1249_v59 }
 0xa1e   : > { %v1679_v60 = vpop.eup %1678 }
 0xa1f   : > { %v1251_v62 = vmul.f32 %v1679_v60, %v1243_v54  ;;  %1270 = sbr.rel (%p1519_p9) target bundleno = 2599 (0xa27), region = 91 }
 0xa21   : > { %v1258_v0 = vmul.f32 %v1517_v61, %v1251_v62 }
 0xa23   : > { %v1265_v1 = vadd.f32 %v1518_v63, %v1258_v0 }
 0xa25   : > { %1266 = vst.msk [vmem:[#allocation2] sm:$0xff] %vm719_vm2, %v1265_v1 }
 0xa26   : > { %1272 = vst.msk [vmem:[%s678_s9] sm:$0x1] %vm1271_vm11, %v1265_v1 }
 0xa27 PF: > { %s2121_s2 = sld [smem:[#allocation11_spill]]  ;;  %s2122_s29 = sld [smem:[#allocation9_spill]] }
 0xa28   : > { %s2123_s30 = sld [smem:[#allocation10_spill]]  ;;  %s2124_s15 = sld [smem:[#allocation12_spill]] }
 0xa29   : > { %s2125_s16 = sld [smem:[#allocation13_spill]] }
 0xa2d   : > { %s24_s17 = sadd.s32 1, %s2121_s2  }
 0xa2e   : > { %p21_p10 = scmp.ge.s32.totalorder %s24_s17, 6  }
 0xa30   :  { %23 = sbr.rel (!%p21_p10) target bundleno = 12 (0xc), region = 187 }

</bundles_post_ra>
